<compile_context>
chip_gen: v7x
topology: tpu7x:2x2x1
jax: 0.10.0
libtpu: 0.0.40
codegen_flags: <defaults>
</compile_context>

<pallas_src>
import functools

import numpy as np
import jax
import jax.numpy as jnp
from jax.experimental import pallas as pl
from jax.experimental.pallas import tpu as pltpu


def _round_up(x, m):
    return ((x + m - 1) // m) * m


def _mlp_kernel(x_ref, w1_ref, b1_ref, w2_ref, b2_ref, o_ref, h_ref):
    # x:  [TILE_N, D] bf16   w1: [D, H] bf16 (resident)   b1: [1, H] f32
    # w2: [H, TILE_V] bf16 (streamed over j)              b2: [1, TILE_V] f32
    # o:  [TILE_N, TILE_V] out_dtype                      h_ref: [TILE_N, H] bf16 scratch
    @pl.when(pl.program_id(1) == 0)
    def _():
        h = jnp.dot(x_ref[...], w1_ref[...], preferred_element_type=jnp.float32)
        h = jnp.maximum(h + b1_ref[...], 0.0)          # bias + ReLU on VPU
        h_ref[...] = h.astype(jnp.bfloat16)             # cached for all vocab tiles

    out = jnp.dot(h_ref[...], w2_ref[...], preferred_element_type=jnp.float32)
    o_ref[...] = (out + b2_ref[...]).astype(o_ref.dtype)


def _pick_tiles(n, v, d, h, out_itemsize, vmem_budget=24 * 1024 * 1024):
    """Pick (tile_n, tile_v). Budget sized for v7x's 64 MiB VMEM part."""
    # Rows: large tiles (fewer ~0.35us grid steps, less w2 re-streaming),
    # multiple of 16 for bf16 sublane packing.  Keep >= 2 row tiles when we
    # have enough rows so the "parallel" i axis shards across v7x's 2 TCs.
    tile_n = min(512, _round_up(n, 16))
    if _round_up(n, tile_n) // tile_n < 2 and _round_up(n, 16) >= 32:
        tile_n = max(16, _round_up((n + 1) // 2, 16))

    def footprint(tv):
        x_t = tile_n * d * 2            # bf16
        w1_t = d * h * 2                # bf16, VMEM-resident
        w2_t = h * tv * 2               # bf16, streamed over j
        out_t = tile_n * tv * out_itemsize
        h_scr = tile_n * h * 2          # bf16 scratch (single buffer)
        return 2 * (x_t + w1_t + w2_t + out_t) + h_scr  # pipeline double-buffers

    # Vocab tile: prefer a divisor of V (no padding, no output-slice copy) that
    # is a multiple of 256 (full-width second matmul on 256-wide MXUs) and fits
    # the VMEM budget.
    for tv in (2048, 1024, 512, 256, 128):
        if v % tv == 0 and footprint(tv) <= vmem_budget:
            return tile_n, tv
    # Fallback: lane-dense padded vocab tile.
    tv = 2048
    while tv > 128 and (footprint(tv) > vmem_budget or tv > _round_up(v, 128)):
        tv //= 2
    return tile_n, max(128, min(tv, _round_up(v, 128)))


@functools.partial(jax.jit, static_argnames=("out_dtype",))
def partd_forward(tokens, params, out_dtype=jnp.float32):
    """Forward pass of PartD: out = model(tokens).

    tokens: int32 [B, S];  params: prepared (bf16 emb/w1/w2, f32 biases).
    returns: [B, S, V] logits in out_dtype (default f32).
    """
    emb, w1, b1, w2, b2 = (params["emb"], params["w1"], params["b1"],
                           params["w2"], params["b2"])
    B, S = tokens.shape
    D = emb.shape[1]
    H = w1.shape[1]
    V = w2.shape[1]
    N = B * S

    # Embedding gather directly in bf16 (emb pre-cast once) — no f32 [N, D]
    # materialize + re-cast round trip.
    x16 = jnp.take(emb, tokens.reshape(-1), axis=0)            # [N, D] bf16

    out_itemsize = np.dtype(out_dtype).itemsize
    tile_n, tile_v = _pick_tiles(N, V, D, H, out_itemsize)
    Np = _round_up(N, tile_n)
    Vp = _round_up(V, tile_v)

    if Np != N:
        x16 = jnp.pad(x16, ((0, Np - N), (0, 0)))
    w2p, b2p = w2, b2
    if Vp != V:
        # Rare: only hit when V has no 128-multiple divisor tile that fits.
        # TODO(synk): hoist this padded copy out of the per-call path if it
        #             ever triggers at vocab scale.
        w2p = jnp.pad(w2, ((0, 0), (0, Vp - V)))
        b2p = jnp.pad(b2, ((0, 0), (0, Vp - V)))

    grid = (Np // tile_n, Vp // tile_v)

    out = pl.pallas_call(
        _mlp_kernel,
        out_shape=jax.ShapeDtypeStruct((Np, Vp), out_dtype),
        grid_spec=pltpu.PrefetchScalarGridSpec(
            num_scalar_prefetch=0,
            grid=grid,
            in_specs=[
                pl.BlockSpec((tile_n, D), lambda i, j: (i, 0)),   # x rows
                pl.BlockSpec((D, H), lambda i, j: (0, 0)),        # w1 resident
                pl.BlockSpec((1, H), lambda i, j: (0, 0)),        # b1 resident
                pl.BlockSpec((H, tile_v), lambda i, j: (0, j)),   # w2 streamed
                pl.BlockSpec((1, tile_v), lambda i, j: (0, j)),   # b2 streamed
            ],
            out_specs=pl.BlockSpec((tile_n, tile_v), lambda i, j: (i, j)),
            scratch_shapes=[pltpu.VMEM((tile_n, H), jnp.bfloat16)],  # cached h
        ),
        compiler_params=pltpu.CompilerParams(
            # j (vocab) MUST be "arbitrary": the h scratch is filled at j == 0
            # and reused across the sequential j loop.  i stays "parallel" so
            # v7x's two TensorCores split the row tiles.
            dimension_semantics=("parallel", "arbitrary"),
            vmem_limit_bytes=48 * 1024 * 1024,
        ),
    )(x16, w1, b1, w2p, b2p)

    if Np != N or Vp != V:
        out = out[:N, :V]
    return out.reshape(B, S, V)


def init_params(key, vocab, d_model, hidden):
    k0, k1, k2 = jax.random.split(key, 3)
    emb = jax.random.normal(k0, (vocab, d_model), jnp.float32) * 0.02
    w1 = jax.random.normal(k1, (d_model, hidden), jnp.float32) * (1.0 / d_model**0.5)
    b1 = jnp.zeros((1, hidden), jnp.float32)
    w2 = jax.random.normal(k2, (hidden, vocab), jnp.float32) * (1.0 / hidden**0.5)
    b2 = jnp.zeros((1, vocab), jnp.float32)
    return {"emb": emb, "w1": w1, "b1": b1, "w2": w2, "b2": b2}


def prepare_params(p):
    """One-time cast of matmul operands to bf16 (outside the hot path)."""
    return {"emb": p["emb"].astype(jnp.bfloat16),
            "w1": p["w1"].astype(jnp.bfloat16),
            "b1": p["b1"],
            "w2": p["w2"].astype(jnp.bfloat16),
            "b2": p["b2"]}


def _reference(tokens, params):
    """Pure-JAX reference reproducing the kernel's bf16-in / f32-accum math."""
    B, S = tokens.shape
    V = params["w2"].shape[1]
    x = jnp.take(params["emb"], tokens.reshape(-1), axis=0)           # bf16 rows
    h = jnp.dot(x, params["w1"], preferred_element_type=jnp.float32) + params["b1"]
    h = jnp.maximum(h, 0.0)
    out = jnp.dot(h.astype(jnp.bfloat16), params["w2"],
                  preferred_element_type=jnp.float32) + params["b2"]
    return out.reshape(B, S, V)


if __name__ == "__main__":
    key = jax.random.PRNGKey(0)
    # Small but lane-dense shapes; V divisible by the vocab tile (no padding).
    B, S = 4, 128             # batch, sequence  -> N = 512 rows
    V, D, H = 1024, 128, 256  # vocab, embed dim, hidden dim

    pkey, tkey = jax.random.split(key)
    params = prepare_params(init_params(pkey, V, D, H))
    tokens = jax.random.randint(tkey, (B, S), 0, V, dtype=jnp.int32)

    out = jax.block_until_ready(partd_forward(tokens, params))
    ref = _reference(tokens, params)
    assert out.shape == (B, S, V)
    assert out.dtype == jnp.float32
    assert jnp.allclose(out, ref, atol=2e-3, rtol=2e-2)

    # Unaligned / small-N path (exercises row padding + tail slicing).
    tokens2 = jax.random.randint(jax.random.PRNGKey(1), (2, 10), 0, V,
                                 dtype=jnp.int32)
    out2 = jax.block_until_ready(partd_forward(tokens2, params))
    ref2 = _reference(tokens2, params)
    assert out2.shape == (2, 10, V)
    assert jnp.allclose(out2, ref2, atol=2e-3, rtol=2e-2)

    # Optional bf16 logits (halves output HBM writeback on bandwidth-poor parts).
    out3 = jax.block_until_ready(partd_forward(tokens, params,
                                               out_dtype=jnp.bfloat16))
    assert out3.dtype == jnp.bfloat16
    assert jnp.allclose(out3.astype(jnp.float32), ref, atol=2e-2, rtol=5e-2)

    print("KERNEL_OK")
</pallas_src>

<mosaic_0001>
module attributes {stable_mosaic.version = 11 : i64} {
  func.func @_mlp_kernel(%arg0: i32, %arg1: i32, %arg2: memref<256x128xbf16, #tpu.memory_space<vmem>>, %arg3: memref<128x256xbf16, #tpu.memory_space<vmem>>, %arg4: memref<1x256xf32, #tpu.memory_space<vmem>>, %arg5: memref<256x1024xbf16, #tpu.memory_space<vmem>>, %arg6: memref<1x1024xf32, #tpu.memory_space<vmem>>, %arg7: memref<256x1024xf32, #tpu.memory_space<vmem>>, %arg8: memref<256x256xbf16, #tpu.memory_space<vmem>>) attributes {dimension_semantics = [#tpu.dimension_semantics<parallel>, #tpu.dimension_semantics<arbitrary>], iteration_bounds = array<i64: 2, 1>, scalar_prefetch = 0 : i64, scratch_operands = 1 : i64, tpu.core_type = #tpu.core_type<tc>, window_params = [{transform_indices = @transform_0, window_bounds = array<i64: 256, 128>}, {pipeline_mode = #tpu.pipeline_mode<synchronous>, transform_indices = @transform_1, window_bounds = array<i64: 128, 256>}, {pipeline_mode = #tpu.pipeline_mode<synchronous>, transform_indices = @transform_2, window_bounds = array<i64: 1, 256>}, {transform_indices = @transform_3, window_bounds = array<i64: 256, 1024>}, {transform_indices = @transform_4, window_bounds = array<i64: 1, 1024>}, {transform_indices = @transform_5, window_bounds = array<i64: 256, 1024>}]} {
    %c0_i32 = arith.constant 0 : i32
    %0 = arith.cmpi eq, %arg1, %c0_i32 : i32
    %1 = arith.extui %0 : i1 to i32
    %c0_i32_0 = arith.constant 0 : i32
    %2 = arith.cmpi ne, %1, %c0_i32_0 : i32
    scf.if %2 {
      %c0_8 = arith.constant 0 : index
      %c0_9 = arith.constant 0 : index
      %10 = vector.load %arg2[%c0_8, %c0_9] : memref<256x128xbf16, #tpu.memory_space<vmem>>, vector<256x128xbf16>
      %c0_10 = arith.constant 0 : index
      %c0_11 = arith.constant 0 : index
      %11 = vector.load %arg3[%c0_10, %c0_11] : memref<128x256xbf16, #tpu.memory_space<vmem>>, vector<128x256xbf16>
      %cst_12 = arith.constant dense<0.000000e+00> : vector<256x256xf32>
      %12 = tpu.matmul %10, %11, %cst_12 {dimension_numbers = #tpu.dot_dimension_numbers<[1], [0], [0], [1], [0, 0, 1, 1], [], []>} : vector<256x128xbf16>, vector<128x256xbf16>, vector<256x256xf32> -> vector<256x256xf32>
      %c0_13 = arith.constant 0 : index
      %c0_14 = arith.constant 0 : index
      %13 = vector.load %arg4[%c0_13, %c0_14] : memref<1x256xf32, #tpu.memory_space<vmem>>, vector<1x256xf32>
      %14 = vector.broadcast %13 : vector<1x256xf32> to vector<256x256xf32>
      %15 = arith.addf %12, %14 : vector<256x256xf32>
      %cst_15 = arith.constant 0.000000e+00 : f32
      %16 = vector.broadcast %cst_15 : f32 to vector<256x256xf32>
      %17 = arith.maximumf %15, %16 : vector<256x256xf32>
      %18 = arith.truncf %17 : vector<256x256xf32> to vector<256x256xbf16>
      %c0_16 = arith.constant 0 : index
      %c0_17 = arith.constant 0 : index
      %19 = vector.load %arg8[%c0_16, %c0_17] : memref<256x256xbf16, #tpu.memory_space<vmem>>, vector<256x256xbf16>
      tpu.vector_store %arg8[%c0_16, %c0_17], %18 {strides = array<i32>} : memref<256x256xbf16, #tpu.memory_space<vmem>>, vector<256x256xbf16>,
    } else {
    }
    %c0 = arith.constant 0 : index
    %c0_1 = arith.constant 0 : index
    %3 = vector.load %arg8[%c0, %c0_1] : memref<256x256xbf16, #tpu.memory_space<vmem>>, vector<256x256xbf16>
    %c0_2 = arith.constant 0 : index
    %c0_3 = arith.constant 0 : index
    %4 = vector.load %arg5[%c0_2, %c0_3] : memref<256x1024xbf16, #tpu.memory_space<vmem>>, vector<256x1024xbf16>
    %cst = arith.constant dense<0.000000e+00> : vector<256x1024xf32>
    %5 = tpu.matmul %3, %4, %cst {dimension_numbers = #tpu.dot_dimension_numbers<[1], [0], [0], [1], [0, 0, 1, 1], [], []>} : vector<256x256xbf16>, vector<256x1024xbf16>, vector<256x1024xf32> -> vector<256x1024xf32>
    %c0_4 = arith.constant 0 : index
    %c0_5 = arith.constant 0 : index
    %6 = vector.load %arg6[%c0_4, %c0_5] : memref<1x1024xf32, #tpu.memory_space<vmem>>, vector<1x1024xf32>
    %7 = vector.broadcast %6 : vector<1x1024xf32> to vector<256x1024xf32>
    %8 = arith.addf %5, %7 : vector<256x1024xf32>
    %c0_6 = arith.constant 0 : index
    %c0_7 = arith.constant 0 : index
    %9 = vector.load %arg7[%c0_6, %c0_7] : memref<256x1024xf32, #tpu.memory_space<vmem>>, vector<256x1024xf32>
    tpu.vector_store %arg7[%c0_6, %c0_7], %8 {strides = array<i32>} : memref<256x1024xf32, #tpu.memory_space<vmem>>, vector<256x1024xf32>,
    return
  }
  func.func @transform_0(%arg0: i32, %arg1: i32) -> (i32, i32) {
    %c0_i32 = arith.constant 0 : i32
    %c0_i32_0 = arith.constant 0 : i32
    return %arg0, %c0_i32 : i32, i32
  }
  func.func @transform_1(%arg0: i32, %arg1: i32) -> (i32, i32) {
    %c0_i32 = arith.constant 0 : i32
    %c0_i32_0 = arith.constant 0 : i32
    %c0_i32_1 = arith.constant 0 : i32
    return %c0_i32, %c0_i32_0 : i32, i32
  }
  func.func @transform_2(%arg0: i32, %arg1: i32) -> (i32, i32) {
    %c0_i32 = arith.constant 0 : i32
    %c0_i32_0 = arith.constant 0 : i32
    %c0_i32_1 = arith.constant 0 : i32
    return %c0_i32, %c0_i32_0 : i32, i32
  }
  func.func @transform_3(%arg0: i32, %arg1: i32) -> (i32, i32) {
    %c0_i32 = arith.constant 0 : i32
    %c0_i32_0 = arith.constant 0 : i32
    return %c0_i32, %arg1 : i32, i32
  }
  func.func @transform_4(%arg0: i32, %arg1: i32) -> (i32, i32) {
    %c0_i32 = arith.constant 0 : i32
    %c0_i32_0 = arith.constant 0 : i32
    return %c0_i32, %arg1 : i32, i32
  }
  func.func @transform_5(%arg0: i32, %arg1: i32) -> (i32, i32) {
    %c0_i32 = arith.constant 0 : i32
    return %arg0, %arg1 : i32, i32
  }
}

</mosaic_0001>

<bundles_post_ra>
// kernel: partd_forward.1
= control target key start
LH: loop header
LB: loop body
LE: loop exit
PB: predicated region body
PF: predicated region fallthrough
CT: control target
= control target key end

     0   :  { %s4766_s0 = inlined_call_operand.vmem [shape: bf16[512,128], index: 0, kind: input, shape index: {}]   ;;  %s4767_s1 = inlined_call_operand.hbm [shape: bf16[128,256], index: 1, kind: input, shape index: {}]   ;;  %s4768_s2 = inlined_call_operand.hbm [shape: f32[1,256], index: 2, kind: input, shape index: {}]   ;;  %s4769_s3 = inlined_call_operand.hbm [shape: bf16[256,1024], index: 3, kind: input, shape index: {}]   ;;  %s4770_s4 = inlined_call_operand.hbm [shape: f32[1,1024], index: 4, kind: input, shape index: {}]   ;;  %s4771_s5 = inlined_call_operand.hbm [shape: f32[512,1024], index: 5, kind: output, shape index: {}]  }
   0x1   :  { %4778 = sst [smem:[#allocation18_spill]] %s4768_s2 }
   0x2   :  { %10 = vsyncpa [#allocation4], 0 }
   0x3   :  { %11 = vsyncpa [#allocation7], 0 }
   0x4   :  { %12 = vsyncpa [#allocation10], 0 }
   0x5   :  { %13 = vsyncpa [#allocation5], 0 }
   0x6   :  { %15 = vsyncpa [#allocation5 + $0x1], 0  ;;  %s3470_s18 = smov 0   ;;  %s3472_s19 = smov 0  }
   0x7   :  { %s3474_s20 = smov 0   ;;  %s3476_s21 = smov 0  }
   0x8   :  { %s3478_s22 = smov 0   ;;  %s3480_s23 = smov 0  }
   0x9 LB: > { %4779 = sst [smem:[#allocation16_spill]] %s3422_s22  ;;  %s2881_s24 = sadd.s32 4294967295, %s3426_s23   ;;  %s3426_s23 = sphi %s3480_s23, %s21_s23   ;;  %s3422_s22 = sphi %s3478_s22, %s4793_s22   ;;  %s3418_s21 = sphi %s3476_s21, %s4792_s21   ;;  %s3414_s20 = sphi %s3474_s20, %s4796_s20   ;;  %s3410_s19 = sphi %s3472_s19, %s4795_s19   ;;  %s3406_s18 = sphi %s3470_s18, %s4794_s18  }
   0xa   : > { %s2882_s25 = sadd.s32 4294967294, %s3426_s23   ;;  %s33_s26 = sadd.s32 1, %s3422_s22 }
   0xb   : > { %s162_s27 = sadd.s32 1, %s3414_s20  ;;  %p35_p0 = scmp.ge.s32.totalorder %s33_s26, 2 }
   0xc   : > { %p172_p1 = scmp.ne.s32.totalorder %s3414_s20, %s3410_s19  ;;  %p173_p2 = scmp.eq.s32.totalorder %s2881_s24, 1 }
   0xd   : > { %p178_p3 = scmp.ne.s32.totalorder %s3410_s19, %s3406_s18  ;;  %s4798_s26 = smov (%p35_p0, %s33_s26), 0 }
   0xe   : > { %4780 = sst [smem:[#allocation17_spill]] %s4798_s26  ;;  %p3510_p4 = por %p173_p2, %p172_p1 }
   0xf   : > { %p179_p5 = scmp.eq.s32.totalorder %s2882_s25, 1  ;;  %s157_s29 = ssub.s32 %s3422_s22, %s4798_s26 }
  0x10   : > { %s4781_s28 = scalar_select %p3510_p4, 1, 0 }
  0x11   : > { %p2883_p6 = scmp.ge.s32.totalorder %s3426_s23, 1  ;;  %p160_p7 = scmp.eq.s32.totalorder %s157_s29, 0 }
  0x12   : > { %p3517_p8 = por %p179_p5, %p178_p3  ;;  %p186_p9 = scmp.lt.s32.totalorder %s3426_s23, 3 }
  0x13   : > { %s3523_s6 = scalar_select %p160_p7, %s3414_s20, %s162_s27  }
  0x14   : > { %s4782_s30 = scalar_select %p3517_p8, 1, 0 }
  0x15   : > { %p3525_p10 = pnand %p2883_p6, %p186_p9  ;;  %p3529_p11 = scmp.eq.s32.totalorder %s2881_s24, 0 }
  0x16   : > { %s3428_s9 = smov [#allocation6]   ;;  %s3429_s12 = smov [#allocation3]  }
  0x17   : > { %s4783_s7 = scalar_select %p3525_p10, 1, 0 }
  0x18   : > { %s4784_s8 = scalar_select %p3529_p11, 1, 0 }
  0x19   : > { %p3099_p12 = pneg %p3525_p10  ;;  %s212_s10 = sshll.u32 %s3428_s9, 4  ;;  %s213_s10 = int_to_ptr.vmem [resolvable:$true] %s212_s10 }
  0x1a   : > { %s198_s13 = sshll.u32 %s3429_s12, 4  ;;  %s4786_s2 = sld [smem:[#allocation18_spill]]  ;;  %s3541_s13 = int_to_ptr.vmem [resolvable:$true] %s198_s13 }
  0x1b   : > { %p3537_p13 = pnand %p3529_p11, %p3099_p12 }
  0x1d   : > { %p3551_p1 = pneg %p3537_p13 }
  0x20   : > { %s3224_s16 = scalar_lea.hbm %s4786_s2, 32 }
  0x21   : > { %p3225_p0 = scmp.ne.s32.totalorder %s4786_s2, %s3224_s16  ;;  %p3231_p5 = scmp.lt.u32.totalorder %s3224_s16, %s4786_s2 }
  0x23   : > { %p3227_p2 = pnand %p3551_p1, %p3225_p0 }
  0x25   : > { %p3228_p3 = pneg %p3227_p2 }
  0x27   : > { %p3233_p6 = pnand %p3231_p5, %p3228_p3 }
  0x29   : > { %3236 = shalt.err (!%p3233_p6)
}
  0x2a   : > { %s3237_s9 = scalar_lea.vmem %s213_s10, 32  ;;  %p3245_p8 = scmp.lt.s32.totalorder %s213_s10, %s213_s10 }
  0x2b   : > { %p3238_p7 = scmp.ne.s32.totalorder %s213_s10, %s3237_s9  ;;  %p3246_p4 = scmp.lt.s32.totalorder %s3237_s9, %s3237_s9 }
  0x2d   : > { %p3240_p9 = pnand %p3238_p7, %p3551_p1  ;;  %p3247_p11 = por %p3246_p4, %p3245_p8 }
  0x2f   : > { %p3241_p12 = pneg %p3240_p9 }
  0x31   : > { %p3248_p10 = pnand %p3247_p11, %p3241_p12 }
  0x33   : > { %3251 = shalt.err (!%p3248_p10)
}
  0x34   : > { %3105 = dma.hbm_to_vmem [thread:$0]  (!%p3537_p13), %s4786_s2, 32, %s213_s10, [#allocation7]  }
  0x35   : > { %s3252_s17 = scalar_lea.hbm %s4767_s1, 2048 }
  0x36   : > { %p3253_p0 = scmp.ne.s32.totalorder %s4767_s1, %s3252_s17  ;;  %p3259_p8 = scmp.lt.u32.totalorder %s3252_s17, %s4767_s1 }
  0x38   : > { %p3255_p2 = pnand %p3253_p0, %p3551_p1 }
  0x3a   : > { %p3256_p4 = pneg %p3255_p2 }
  0x3c   : > { %p3261_p10 = pnand %p3259_p8, %p3256_p4 }
  0x3e   : > { %3264 = shalt.err (!%p3261_p10)
}
  0x3f   : > { %s3265_s10 = scalar_lea.vmem %s3541_s13, 2048  ;;  %p3273_p6 = scmp.lt.s32.totalorder %s3541_s13, %s3541_s13 }
  0x40   : > { %p3266_p11 = scmp.ne.s32.totalorder %s3541_s13, %s3265_s10  ;;  %p3274_p7 = scmp.lt.s32.totalorder %s3265_s10, %s3265_s10 }
  0x42   : > { %p3268_p3 = pnand %p3266_p11, %p3551_p1  ;;  %p3275_p9 = por %p3274_p7, %p3273_p6 }
  0x44   : > { %p3269_p5 = pneg %p3268_p3 }
  0x46   : > { %p3276_p12 = pnand %p3275_p9, %p3269_p5 }
  0x48   : > { %3279 = shalt.err (!%p3276_p12)
}
  0x49   : > { %s3430_s12 = smov 128   ;;  %s3431_s14 = smov 8  }
  0x4a   : > { %3102 = dma.hbm_to_vmem [thread:$0]  (!%p3537_p13), %s4767_s1, 2048, %s3541_s13, [#allocation4], %s3430_s12, %s3430_s12, %s3431_s14  }
  0x4b   : > { %s3432_s17 = smov [#allocation8]   ;;  %s3280_s9 = scalar_lea.hbm %s4769_s3, 16384 }
  0x4c   : > { %s225_s24 = sshll.u32 %s3432_s17, 4  ;;  %p3281_p0 = scmp.ne.s32.totalorder %s4769_s3, %s3280_s9  ;;  %s226_s24 = int_to_ptr.vmem [resolvable:$true] %s225_s24 }
  0x4d   : > { %p3287_p8 = scmp.lt.u32.totalorder %s3280_s9, %s4769_s3 }
  0x4e   : > { %p3283_p2 = pnand %p3281_p0, %p3551_p1 }
  0x50   : > { %p3284_p4 = pneg %p3283_p2 }
  0x52   : > { %p3289_p10 = pnand %p3287_p8, %p3284_p4 }
  0x54   : > { %3292 = shalt.err (!%p3289_p10)
}
  0x55   : > { %s3293_s13 = scalar_lea.vmem %s226_s24, 16384  ;;  %p3301_p6 = scmp.lt.s32.totalorder %s226_s24, %s226_s24 }
  0x56   : > { %p3294_p11 = scmp.ne.s32.totalorder %s226_s24, %s3293_s13  ;;  %p3302_p7 = scmp.lt.s32.totalorder %s3293_s13, %s3293_s13 }
  0x58   : > { %p3296_p3 = pnand %p3294_p11, %p3551_p1  ;;  %p3303_p9 = por %p3302_p7, %p3301_p6 }
  0x5a   : > { %p3297_p5 = pneg %p3296_p3 }
  0x5c   : > { %p3304_p12 = pnand %p3303_p9, %p3297_p5 }
  0x5e   : > { %3307 = shalt.err (!%p3304_p12)
}
  0x5f   : > { %s3433_s2 = smov 512   ;;  %s3434_s12 = smov 32  }
  0x60   : > { %3108 = dma.hbm_to_vmem [thread:$0]  (!%p3537_p13), %s4769_s3, 16384, %s226_s24, [#allocation7], %s3433_s2, %s3433_s2, %s3434_s12  }
  0x61   : > { %s3435_s14 = smov [#allocation9]   ;;  %s3308_s27 = scalar_lea.hbm %s4770_s4, 128 }
  0x62   : > { %s242_s15 = sshll.u32 %s3435_s14, 4  ;;  %p3309_p0 = scmp.ne.s32.totalorder %s4770_s4, %s3308_s27  ;;  %s243_s15 = int_to_ptr.vmem [resolvable:$true] %s242_s15 }
  0x63   : > { %p3315_p8 = scmp.lt.u32.totalorder %s3308_s27, %s4770_s4 }
  0x64   : > { %p3311_p2 = pnand %p3309_p0, %p3551_p1 }
  0x66   : > { %p3312_p4 = pneg %p3311_p2 }
  0x68   : > { %p3317_p10 = pnand %p3315_p8, %p3312_p4 }
  0x6a   : > { %3320 = shalt.err (!%p3317_p10)
}
  0x6b   : > { %s3321_s24 = scalar_lea.vmem %s243_s15, 128  ;;  %p3329_p6 = scmp.lt.s32.totalorder %s243_s15, %s243_s15 }
  0x6c   : > { %p3322_p11 = scmp.ne.s32.totalorder %s243_s15, %s3321_s24  ;;  %p3330_p7 = scmp.lt.s32.totalorder %s3321_s24, %s3321_s24 }
  0x6e   : > { %p3324_p3 = pnand %p3322_p11, %p3551_p1  ;;  %p3331_p9 = por %p3330_p7, %p3329_p6 }
  0x70   : > { %p3325_p5 = pneg %p3324_p3 }
  0x72   : > { %p3332_p12 = pnand %p3331_p9, %p3325_p5 }
  0x74   : > { %3335 = shalt.err (!%p3332_p12)
}
  0x75   : > { %3111 = dma.hbm_to_vmem [thread:$0]  (!%p3537_p13), %s4770_s4, 128, %s243_s15, [#allocation10]  }
  0x76   : > { %p4788_p0 = scmp.ne.s32.totalorder %s4783_s7, 0 }
  0x77   : > { %p4789_p2 = scmp.ne.s32.totalorder (!%p4788_p0), %s4784_s8, 0 }
  0x78   : > { %264 = sbr.rel (%p4788_p0) target bundleno = 868 (0x364), region = 40 }
  0x7f   : > { %3389 = dma.done.wait (%p4789_p2), [#allocation4], 2048  }
  0x80   : > { %3391 = vsyncadd (%p4789_p2), [#allocation4], 4294965248 }
  0x81   : > { %3393 = dma.done.wait (%p4789_p2), [#allocation7], 16416  }
  0x82   : > { %3395 = vsyncadd (%p4789_p2), [#allocation7], 4294950880 }
  0x83   : > { %3397 = dma.done.wait (%p4789_p2), [#allocation10], 128  }
  0x84   : > { %3399 = vsyncadd (%p4789_p2), [#allocation10], 4294967168  ;;  %v3436_v0 = vmov 0   ;;  %s2895_s7 = sshll.u32 %s3418_s21, 5  ;;  %v3184_v1 = vld [vmem:[#allocation3 + $0x4] ss:$8 sps:$4 sm:$0xff]  }
  0x85   : > { %587 = vmatprep.mubr.bf16.mxu0 %v3436_v0  ;;  %667 = vmatprep.mubr.bf16.mxu1 %v3436_v0  ;;  %p305_p13 = scmp.lt.s32.totalorder %s2895_s7, 63  ;;  %v3186_v2 = vld [vmem:[#allocation3] ss:$8 sps:$4 sm:$0xff]   ;;  %v3187_v3 = vld [vmem:[#allocation3 + $0x14] ss:$8 sps:$4 sm:$0xff]   ;;  %s301_s26 = sand.u32 1, %s3410_s19  }
  0x86   : > { %555 = vmatprep.subr.bf16.mxu0 %v3184_v1  ;;  %3065 = vmatprep.subr.bf16.mxu1 %v3184_v1  ;;  %v3189_v4 = vld [vmem:[#allocation3 + $0x10] ss:$8 sps:$4 sm:$0xff]   ;;  %v3190_v5 = vld [vmem:[#allocation3 + $0x24] ss:$8 sps:$4 sm:$0xff]   ;;  %v3192_v6 = vld [vmem:[#allocation3 + $0x20] ss:$8 sps:$4 sm:$0xff]  }
  0x87   : > { %s4800_s7 = smov (!%p305_p13, %s2895_s7), 63  ;;  %556 = vmatpush1.bf16.msra.mxu0 %v3186_v2  ;;  %3073 = vmatpush1.bf16.msra.mxu1 %v3186_v2  ;;  %v3193_v7 = vld [vmem:[#allocation3 + $0x34] ss:$8 sps:$4 sm:$0xff]   ;;  %v3195_v8 = vld [vmem:[#allocation3 + $0x30] ss:$8 sps:$4 sm:$0xff]   ;;  %v908_v17 = vld [vmem:[#allocation8] sm:$0xff] }
  0x88   : > { %557 = vmatprep.subr.bf16.mxu0 %v3187_v3  ;;  %3066 = vmatprep.subr.bf16.mxu1 %v3187_v3  ;;  %s2896_s8 = sshll.u32 %s4800_s7, 2  ;;  %v3196_v9 = vld [vmem:[#allocation3 + $0x44] ss:$8 sps:$4 sm:$0xff]   ;;  %v3198_v10 = vld [vmem:[#allocation3 + $0x40] ss:$8 sps:$4 sm:$0xff]   ;;  %s2894_s14 = sshll.u32 %s301_s26, 11 }
  0x89   : > { %s3646_s22 = scalar_lea.vmem %s4766_s0, %s2896_s8  ;;  %v3199_v11 = vld [vmem:[#allocation3 + $0x54] ss:$8 sps:$4 sm:$0xff]   ;;  %v3201_v12 = vld [vmem:[#allocation3 + $0x50] ss:$8 sps:$4 sm:$0xff]   ;;  %v3202_v13 = vld [vmem:[#allocation3 + $0x64] ss:$8 sps:$4 sm:$0xff]  }
  0x8a   : > { %v3204_v14 = vld [vmem:[#allocation3 + $0x60] ss:$8 sps:$4 sm:$0xff]   ;;  %v3205_v15 = vld [vmem:[#allocation3 + $0x74] ss:$8 sps:$4 sm:$0xff]   ;;  %v3207_v16 = vld [vmem:[#allocation3 + $0x70] ss:$8 sps:$4 sm:$0xff]  }
  0x8b   : > { %558 = vmatpush1.bf16.msra.mxu0 %v3189_v4  ;;  %3074 = vmatpush1.bf16.msra.mxu1 %v3189_v4  ;;  %v912_v18 = vld [vmem:[#allocation8 + $0x20] sm:$0xff]  ;;  %v909_v19 = vld [vmem:[#allocation8 + $0x8] sm:$0xff]  ;;  %s4165_s15 = scalar_lea.vmem [#allocation11], %s2894_s14  ;;  %s3064_s16 = sshll.u32 %s3418_s21, 15 }
  0x8c   : > { %559 = vmatprep.subr.bf16.mxu0 %v3190_v5  ;;  %3067 = vmatprep.subr.bf16.mxu1 %v3190_v5  ;;  %v913_v20 = vld [vmem:[#allocation8 + $0x28] sm:$0xff]  ;;  %v2930_v21 = vcombine.high %v908_v17, %v912_v18  ;;  %v3208_v22 = vld [vmem:[%s3646_s22] sm:$0xff]   ;;  %v2929_v29 = vcombine.low %v908_v17, %v912_v18  ;;  %s2763_s17 = sshll.u32 %s4165_s15, 4  ;;  %s4706_s29 = scalar_lea.hbm %s4771_s5, %s3064_s16  ;;  %s4708_s17 = int_to_ptr.vmem [resolvable:$true] %s2763_s17 }
  0x8d   : > { %v3216_v23 = vld [vmem:[%s3646_s22 + $0x40] sm:$0xff]   ;;  %v2932_v24 = vcombine.high %v909_v19, %v913_v20  ;;  %v917_v27 = vld [vmem:[#allocation8 + $0x48] sm:$0xff]  ;;  %v2931_v30 = vcombine.low %v909_v19, %v913_v20  ;;  %s4720_s9 = scalar_lea.sflag [#allocation5], %s301_s26  ;;  %s3336_s10 = scalar_lea.vmem %s4708_s17, 32768 }
  0x8e   : > { %v916_v25 = vld [vmem:[#allocation8 + $0x40] sm:$0xff]  ;;  %v921_v28 = vld [vmem:[#allocation8 + $0x68] sm:$0xff]  ;;  %p3337_p1 = scmp.ne.s32.totalorder %s4708_s17, %s3336_s10  ;;  %p4790_p4 = scmp.ne.s32.totalorder %s4781_s28, 0 }
  0x8f   : > { %560 = vmatpush1.bf16.msra.mxu0 %v3192_v6  ;;  %3075 = vmatpush1.bf16.msra.mxu1 %v3192_v6  ;;  %v920_v26 = vld [vmem:[#allocation8 + $0x60] sm:$0xff]  ;;  %v2940_v32 = vcombine.high %v917_v27, %v921_v28  ;;  %v925_v35 = vld [vmem:[#allocation8 + $0x88] sm:$0xff]  ;;  %v2939_v38 = vcombine.low %v917_v27, %v921_v28  ;;  %s3437_s13 = smov [#allocation11]  }
  0x90   : > { %561 = vmatprep.subr.bf16.mxu0 %v3193_v7  ;;  %3068 = vmatprep.subr.bf16.mxu1 %v3193_v7  ;;  %v2938_v31 = vcombine.high %v916_v25, %v920_v26  ;;  %v924_v33 = vld [vmem:[#allocation8 + $0x80] sm:$0xff]  ;;  %v929_v36 = vld [vmem:[#allocation8 + $0xa8] sm:$0xff]  ;;  %v2937_v37 = vcombine.low %v916_v25, %v920_v26  ;;  %p3338_p8 = pnand %p3337_p1, %p4790_p4  ;;  %s3340_s24 = sshll.u32 %s3437_s13, 4  ;;  %s3341_s24 = int_to_ptr.vmem [resolvable:$false] %s3340_s24 }
  0x91   : > { %v928_v34 = vld [vmem:[#allocation8 + $0xa0] sm:$0xff]  ;;  %v2948_v42 = vcombine.high %v925_v35, %v929_v36  ;;  %v933_v45 = vld [vmem:[#allocation8 + $0xc8] sm:$0xff]  ;;  %v2947_v48 = vcombine.low %v925_v35, %v929_v36  ;;  %s3342_s2 = scalar_lea.vmem %s3341_s24, 65536  ;;  %p3343_p11 = scmp.lt.s32.totalorder %s4708_s17, %s3341_s24 }
  0x92   : > { %v3209_v39 = vld [vmem:[%s3646_s22 + $0x8] sm:$0xff]   ;;  %v2946_v41 = vcombine.high %v924_v33, %v928_v34  ;;  %v2945_v47 = vcombine.low %v924_v33, %v928_v34  ;;  %v3210_v57 = vld [vmem:[%s3646_s22 + $0x10] sm:$0xff]   ;;  %p3339_p10 = pneg %p3338_p8  ;;  %p3344_p3 = scmp.lt.s32.totalorder %s3342_s2, %s3336_s10 }
  0x93   : > { %562 = vmatpush1.bf16.msra.mxu0 %v3195_v8  ;;  %3076 = vmatpush1.bf16.msra.mxu1 %v3195_v8  ;;  %v3217_v40 = vld [vmem:[%s3646_s22 + $0x48] sm:$0xff]   ;;  %v3218_v58 = vld [vmem:[%s3646_s22 + $0x50] sm:$0xff]  }
  0x94   : > { %563 = vmatprep.subr.bf16.mxu0 %v3196_v9  ;;  %3069 = vmatprep.subr.bf16.mxu1 %v3196_v9  ;;  %v932_v43 = vld [vmem:[#allocation8 + $0xc0] sm:$0xff]  ;;  %v937_v46 = vld [vmem:[#allocation8 + $0xe8] sm:$0xff]  ;;  %p3345_p5 = por %p3344_p3, %p3343_p11 }
  0x95   : > { %v936_v44 = vld [vmem:[#allocation8 + $0xe0] sm:$0xff]  ;;  %v2956_v50 = vcombine.high %v933_v45, %v937_v46  ;;  %v941_v53 = vld [vmem:[#allocation8 + $0x108] sm:$0xff]  ;;  %v2955_v56 = vcombine.low %v933_v45, %v937_v46 }
  0x96   : > { %v2954_v49 = vcombine.high %v932_v43, %v936_v44  ;;  %v940_v51 = vld [vmem:[#allocation8 + $0x100] sm:$0xff]  ;;  %v945_v54 = vld [vmem:[#allocation8 + $0x128] sm:$0xff]  ;;  %v2953_v55 = vcombine.low %v932_v43, %v936_v44  ;;  %p3346_p6 = pnand %p3345_p5, %p3339_p10 }
  0x97   : > { %564 = vmatpush1.bf16.msra.mxu0 %v3198_v10  ;;  %3077 = vmatpush1.bf16.msra.mxu1 %v3198_v10  ;;  %v944_v52 = vld [vmem:[#allocation8 + $0x120] sm:$0xff]  ;;  %v2964_v60 = vcombine.high %v941_v53, %v945_v54  ;;  %v949_v63 = vld [vmem:[#allocation8 + $0x148] sm:$0xff]  ;;  %v2963_v3 = vcombine.low %v941_v53, %v945_v54 }
  0x98   : > { %565 = vmatprep.subr.bf16.mxu0 %v3199_v11  ;;  %3070 = vmatprep.subr.bf16.mxu1 %v3199_v11  ;;  %v2962_v59 = vcombine.high %v940_v51, %v944_v52  ;;  %v948_v61 = vld [vmem:[#allocation8 + $0x140] sm:$0xff]  ;;  %v953_v1 = vld [vmem:[#allocation8 + $0x168] sm:$0xff]  ;;  %v2961_v2 = vcombine.low %v940_v51, %v944_v52 }
  0x99   : > { %v952_v62 = vld [vmem:[#allocation8 + $0x160] sm:$0xff]  ;;  %v2972_v5 = vcombine.high %v949_v63, %v953_v1  ;;  %v957_v8 = vld [vmem:[#allocation8 + $0x188] sm:$0xff]  ;;  %v2971_v11 = vcombine.low %v949_v63, %v953_v1 }
  0x9a   : > { %v2970_v4 = vcombine.high %v948_v61, %v952_v62  ;;  %v956_v6 = vld [vmem:[#allocation8 + $0x180] sm:$0xff]  ;;  %v961_v9 = vld [vmem:[#allocation8 + $0x1a8] sm:$0xff]  ;;  %v2969_v10 = vcombine.low %v948_v61, %v952_v62 }
  0x9b   : > { %566 = vmatpush1.bf16.msra.mxu0 %v3201_v12  ;;  %3078 = vmatpush1.bf16.msra.mxu1 %v3201_v12  ;;  %v960_v7 = vld [vmem:[#allocation8 + $0x1a0] sm:$0xff]  ;;  %v3211_v12 = vld [vmem:[%s3646_s22 + $0x18] sm:$0xff]   ;;  %v965_v18 = vld [vmem:[#allocation8 + $0x1c8] sm:$0xff] }
  0x9c   : > { %567 = vmatprep.subr.bf16.mxu0 %v3202_v13  ;;  %3071 = vmatprep.subr.bf16.mxu1 %v3202_v13  ;;  %v3219_v13 = vld [vmem:[%s3646_s22 + $0x58] sm:$0xff]   ;;  %v968_v17 = vld [vmem:[#allocation8 + $0x1e0] sm:$0xff]  ;;  %v969_v19 = vld [vmem:[#allocation8 + $0x1e8] sm:$0xff]  ;;  %v2977_v20 = vcombine.low %v956_v6, %v960_v7 }
  0x9d   : > { %v976_v25 = vld [vmem:[#allocation8 + $0x220] sm:$0xff]  ;;  %v973_v26 = vld [vmem:[#allocation8 + $0x208] sm:$0xff] }
  0x9e   : > { %v977_v27 = vld [vmem:[#allocation8 + $0x228] sm:$0xff]  ;;  %v980_v34 = vld [vmem:[#allocation8 + $0x240] sm:$0xff] }
  0x9f   : > { %568 = vmatpush1.bf16.msra.mxu0 %v3204_v14  ;;  %3079 = vmatpush1.bf16.msra.mxu1 %v3204_v14  ;;  %v2978_v14 = vcombine.high %v956_v6, %v960_v7  ;;  %v2996_v33 = vcombine.high %v973_v26, %v977_v27  ;;  %v984_v35 = vld [vmem:[#allocation8 + $0x260] sm:$0xff]  ;;  %v981_v36 = vld [vmem:[#allocation8 + $0x248] sm:$0xff] }
  0xa0   : > { %569 = vmatprep.subr.bf16.mxu0 %v3205_v15  ;;  %3072 = vmatprep.subr.bf16.mxu1 %v3205_v15  ;;  %v2980_v15 = vcombine.high %v957_v8, %v961_v9  ;;  %v992_v43 = vld [vmem:[#allocation8 + $0x2a0] sm:$0xff]  ;;  %v989_v44 = vld [vmem:[#allocation8 + $0x288] sm:$0xff]  ;;  %v3001_v46 = vcombine.low %v980_v34, %v984_v35 }
  0xa1   : > { %v993_v45 = vld [vmem:[#allocation8 + $0x2a8] sm:$0xff]  ;;  %v996_v52 = vld [vmem:[#allocation8 + $0x2c0] sm:$0xff] }
  0xa2   : > { %v3012_v51 = vcombine.high %v989_v44, %v993_v45  ;;  %v1000_v53 = vld [vmem:[#allocation8 + $0x2e0] sm:$0xff]  ;;  %v997_v54 = vld [vmem:[#allocation8 + $0x2c8] sm:$0xff] }
  0xa3   : > { %570 = vmatpush1.bf16.msra.mxu0 %v3207_v16  ;;  %3080 = vmatpush1.bf16.msra.mxu1 %v3207_v16  ;;  %v964_v16 = vld [vmem:[#allocation8 + $0x1c0] sm:$0xff]  ;;  %v1005_v62 = vld [vmem:[#allocation8 + $0x308] sm:$0xff]  ;;  %v3017_v1 = vcombine.low %v996_v52, %v1000_v53 }
  0xa4   : > { %1718 = vmatprep.subr.bf16.mxu1 %v2930_v21  ;;  %1911 = vmatprep.subr.bf16.mxu0 %v2932_v24  ;;  %v2979_v21 = vcombine.low %v957_v8, %v961_v9  ;;  %v972_v24 = vld [vmem:[#allocation8 + $0x200] sm:$0xff]  ;;  %v2985_v28 = vcombine.low %v964_v16, %v968_v17  ;;  %v1009_v63 = vld [vmem:[#allocation8 + $0x328] sm:$0xff] }
  0xa5   : > { %v1008_v61 = vld [vmem:[#allocation8 + $0x320] sm:$0xff]  ;;  %v3028_v6 = vcombine.high %v1005_v62, %v1009_v63  ;;  %v1013_v9 = vld [vmem:[#allocation8 + $0x348] sm:$0xff] }
  0xa6   : > { %588 = vmatmul.mubr.bf16.vlgmr.msra.gmra.mrb[0].mxu0 %v3208_v22  ;;  %668 = vmatmul.mubr.bf16.vlgmr.msra.gmra.mrb[0].mxu1 %v3216_v23  ;;  %v2986_v22 = vcombine.high %v964_v16, %v968_v17  ;;  %v2988_v23 = vcombine.high %v965_v18, %v969_v19  ;;  %v1012_v7 = vld [vmem:[#allocation8 + $0x340] sm:$0xff]  ;;  %v3215_v17 = vld [vmem:[%s3646_s22 + $0x38] sm:$0xff]  }
  0xa7   : > { %597 = vmatprep.mubr.bf16.mxu0 %v3436_v0  ;;  %677 = vmatprep.mubr.bf16.mxu1 %v3436_v0  ;;  %v1016_v8 = vld [vmem:[#allocation8 + $0x360] sm:$0xff] }
  0xa8   : > { %1719 = vmatpush1.bf16.msra.mxu1 %v2929_v29  ;;  %1912 = vmatpush1.bf16.msra.mxu0 %v2931_v30  ;;  %v2987_v29 = vcombine.low %v965_v18, %v969_v19  ;;  %v3212_v30 = vld [vmem:[%s3646_s22 + $0x20] sm:$0xff]   ;;  %v3223_v18 = vld [vmem:[%s3646_s22 + $0x78] sm:$0xff]  }
  0xa9   : > { %1720 = vmatprep.subr.bf16.mxu1 %v2938_v31  ;;  %1913 = vmatprep.subr.bf16.mxu0 %v2940_v32  ;;  %v3220_v31 = vld [vmem:[%s3646_s22 + $0x60] sm:$0xff]   ;;  %v2994_v32 = vcombine.high %v972_v24, %v976_v25 }
  0xaa   : > { %v1020_v19 = vld [vmem:[#allocation8 + $0x380] sm:$0xff] }
  0xac   : > { %1721 = vmatpush1.bf16.msra.mxu1 %v2937_v37  ;;  %1914 = vmatpush1.bf16.msra.mxu0 %v2939_v38  ;;  %v985_v37 = vld [vmem:[#allocation8 + $0x268] sm:$0xff]  ;;  %v2993_v38 = vcombine.low %v972_v24, %v976_v25 }
  0xad   : > { %1722 = vmatprep.subr.bf16.mxu1 %v2946_v41  ;;  %1915 = vmatprep.subr.bf16.mxu0 %v2948_v42  ;;  %v3004_v41 = vcombine.high %v981_v36, %v985_v37  ;;  %v988_v42 = vld [vmem:[#allocation8 + $0x280] sm:$0xff] }
  0xae   : > { %598 = vmatmul.mubr.bf16.gmra.mrb[4].mxu0 %v3209_v39  ;;  %678 = vmatmul.mubr.bf16.gmra.mrb[4].mxu1 %v3217_v40  ;;  %v2995_v39 = vcombine.low %v973_v26, %v977_v27  ;;  %v3002_v40 = vcombine.high %v980_v34, %v984_v35  ;;  %v1028_v26 = vld [vmem:[#allocation8 + $0x3c0] sm:$0xff]  ;;  %v3678_v34 = vld [vmem:[#allocation8 + $0x10] sm:$0xff] }
  0xaf   : > { %607 = vmatprep.mubr.bf16.mxu0 %v3436_v0  ;;  %687 = vmatprep.mubr.bf16.mxu1 %v3436_v0  ;;  %v1032_v27 = vld [vmem:[#allocation8 + $0x3e0] sm:$0xff]  ;;  %v3680_v35 = vld [vmem:[#allocation8 + $0x30] sm:$0xff] }
  0xb0   : > { %1723 = vmatpush1.bf16.msra.mxu1 %v2945_v47  ;;  %1916 = vmatpush1.bf16.msra.mxu0 %v2947_v48  ;;  %v3003_v47 = vcombine.low %v981_v36, %v985_v37  ;;  %v3213_v48 = vld [vmem:[%s3646_s22 + $0x28] sm:$0xff]   ;;  %v2933_v36 = vcombine.low %v3678_v34, %v3680_v35  ;;  %v2934_v37 = vcombine.high %v3678_v34, %v3680_v35  ;;  %v3758_v34 = vld [vmem:[#allocation8 + $0xf0] sm:$0xff] }
  0xb1   : > { %1724 = vmatprep.subr.bf16.mxu1 %v2954_v49  ;;  %1917 = vmatprep.subr.bf16.mxu0 %v2956_v50  ;;  %v3221_v49 = vld [vmem:[%s3646_s22 + $0x68] sm:$0xff]   ;;  %v3010_v50 = vcombine.high %v988_v42, %v992_v43 }
  0xb4   : > { %1725 = vmatpush1.bf16.msra.mxu1 %v2953_v55  ;;  %1918 = vmatpush1.bf16.msra.mxu0 %v2955_v56  ;;  %v1001_v55 = vld [vmem:[#allocation8 + $0x2e8] sm:$0xff]  ;;  %v3009_v56 = vcombine.low %v988_v42, %v992_v43  ;;  %v369_v42 = vlaneseq }
  0xb5   : > { %1726 = vmatprep.subr.bf16.mxu1 %v2962_v59  ;;  %1919 = vmatprep.subr.bf16.mxu0 %v2964_v60  ;;  %v3020_v59 = vcombine.high %v997_v54, %v1001_v55  ;;  %v1004_v60 = vld [vmem:[#allocation8 + $0x300] sm:$0xff] }
  0xb6   : > { %608 = vmatmul.mubr.bf16.gmra.mrb[8].mxu0 %v3210_v57  ;;  %688 = vmatmul.mubr.bf16.gmra.mrb[8].mxu1 %v3218_v58  ;;  %v3011_v57 = vcombine.low %v989_v44, %v993_v45  ;;  %v3018_v58 = vcombine.high %v996_v52, %v1000_v53  ;;  %v3694_v43 = vshrl.u32 %v369_v42, 7  ;;  %v367_v45 = vld [vmem:[#allocation6] sm:$0x3] }
  0xb7   : > { %617 = vmatprep.mubr.bf16.mxu0 %v3436_v0  ;;  %697 = vmatprep.mubr.bf16.mxu1 %v3436_v0 }
  0xb8   : > { %1727 = vmatpush1.bf16.msra.mxu1 %v2961_v2  ;;  %1920 = vmatpush1.bf16.msra.mxu0 %v2963_v3  ;;  %v3019_v2 = vcombine.low %v997_v54, %v1001_v55  ;;  %v3214_v3 = vld [vmem:[%s3646_s22 + $0x30] sm:$0xff]   ;;  %v371_v44 = vsub.s32 0, %v3694_v43 }
  0xb9   : > { %1728 = vmatprep.subr.bf16.mxu1 %v2970_v4  ;;  %1921 = vmatprep.subr.bf16.mxu0 %v2972_v5  ;;  %v3222_v4 = vld [vmem:[%s3646_s22 + $0x70] sm:$0xff]   ;;  %v3026_v5 = vcombine.high %v1004_v60, %v1008_v61 }
  0xbc   : > { %1729 = vmatpush1.bf16.msra.mxu1 %v2969_v10  ;;  %1922 = vmatpush1.bf16.msra.mxu0 %v2971_v11  ;;  %v1017_v10 = vld [vmem:[#allocation8 + $0x368] sm:$0xff]  ;;  %v3025_v11 = vcombine.low %v1004_v60, %v1008_v61 }
  0xbd   : > { %1730 = vmatprep.subr.bf16.mxu1 %v2978_v14  ;;  %1923 = vmatprep.subr.bf16.mxu0 %v2980_v15  ;;  %v3036_v14 = vcombine.high %v1013_v9, %v1017_v10  ;;  %v3033_v15 = vcombine.low %v1012_v7, %v1016_v8  ;;  %v3035_v16 = vcombine.low %v1013_v9, %v1017_v10  ;;  %v922_v10 = vld [vmem:[#allocation8 + $0x70] sm:$0xff] }
  0xbe   : > { %618 = vmatmul.mubr.bf16.gmra.mrb[12].mxu0 %v3211_v12  ;;  %698 = vmatmul.mubr.bf16.gmra.mrb[12].mxu1 %v3219_v13  ;;  %v3027_v12 = vcombine.low %v1005_v62, %v1009_v63  ;;  %v3034_v13 = vcombine.high %v1012_v7, %v1016_v8 }
  0xbf   : > { %627 = vmatprep.mubr.bf16.mxu0 %v3436_v0  ;;  %707 = vmatprep.mubr.bf16.mxu1 %v3436_v0 }
  0xc0   : > { %1731 = vmatpush1.bf16.msra.mxu1 %v2977_v20  ;;  %1924 = vmatpush1.bf16.msra.mxu0 %v2979_v21  ;;  %v1024_v20 = vld [vmem:[#allocation8 + $0x3a0] sm:$0xff]  ;;  %v1021_v21 = vld [vmem:[#allocation8 + $0x388] sm:$0xff] }
  0xc1   : > { %1732 = vmatprep.subr.bf16.mxu1 %v2986_v22  ;;  %1925 = vmatprep.subr.bf16.mxu0 %v2988_v23  ;;  %v3042_v22 = vcombine.high %v1020_v19, %v1024_v20  ;;  %v1025_v23 = vld [vmem:[#allocation8 + $0x3a8] sm:$0xff]  ;;  %v3041_v24 = vcombine.low %v1020_v19, %v1024_v20 }
  0xc2   : > { %v3043_v25 = vcombine.low %v1021_v21, %v1025_v23 }
  0xc4   : > { %1733 = vmatpush1.bf16.msra.mxu1 %v2985_v28  ;;  %1926 = vmatpush1.bf16.msra.mxu0 %v2987_v29  ;;  %v1029_v28 = vld [vmem:[#allocation8 + $0x3c8] sm:$0xff]  ;;  %v3050_v29 = vcombine.high %v1028_v26, %v1032_v27 }
  0xc5   : > { %1734 = vmatprep.subr.bf16.mxu1 %v2994_v32  ;;  %1927 = vmatprep.subr.bf16.mxu0 %v2996_v33 }
  0xc6   : > { %628 = vmatmul.mubr.bf16.gmra.mrb[16].mxu0 %v3212_v30  ;;  %708 = vmatmul.mubr.bf16.gmra.mrb[16].mxu1 %v3220_v31  ;;  %v1033_v30 = vld [vmem:[#allocation8 + $0x3e8] sm:$0xff]  ;;  %v3049_v31 = vcombine.low %v1028_v26, %v1032_v27 }
  0xc7   : > { %637 = vmatprep.mubr.bf16.mxu0 %v3436_v0  ;;  %717 = vmatprep.mubr.bf16.mxu1 %v3436_v0  ;;  %v3051_v32 = vcombine.low %v1029_v28, %v1033_v30  ;;  %v3052_v33 = vcombine.high %v1029_v28, %v1033_v30  ;;  %v3735_v30 = vld [vmem:[#allocation8 + $0x98] sm:$0xff] }
  0xc8   : > { %1735 = vmatpush1.bf16.msra.mxu1 %v2993_v38  ;;  %1928 = vmatpush1.bf16.msra.mxu0 %v2995_v39  ;;  %v3686_v38 = vld [vmem:[#allocation8 + $0x18] sm:$0xff] }
  0xc9   : > { %1736 = vmatprep.subr.bf16.mxu1 %v3002_v40  ;;  %1929 = vmatprep.subr.bf16.mxu0 %v3004_v41  ;;  %v3688_v39 = vld [vmem:[#allocation8 + $0x38] sm:$0xff] }
  0xca   : > { %v2935_v40 = vcombine.low %v3686_v38, %v3688_v39  ;;  %v2936_v41 = vcombine.high %v3686_v38, %v3688_v39  ;;  %v3760_v39 = vld [vmem:[#allocation8 + $0xd8] sm:$0xff] }
  0xcc   : > { %1737 = vmatpush1.bf16.msra.mxu1 %v3001_v46  ;;  %1930 = vmatpush1.bf16.msra.mxu0 %v3003_v47  ;;  %v375_v46 = vsub.s32 1, %v3694_v43  ;;  %v3700_v47 = vrot.slane %v367_v45, %v371_v44 }
  0xcd   : > { %1738 = vmatprep.subr.bf16.mxu1 %v3010_v50  ;;  %1931 = vmatprep.subr.bf16.mxu0 %v3012_v51 }
  0xce   : > { %638 = vmatmul.mubr.bf16.gmra.mrb[20].mxu0 %v3213_v48  ;;  %718 = vmatmul.mubr.bf16.gmra.mrb[20].mxu1 %v3221_v49  ;;  %v3704_v48 = vrot.slane %v367_v45, %v375_v46 }
  0xcf   : > { %647 = vmatprep.mubr.bf16.mxu0 %v3436_v0  ;;  %727 = vmatprep.mubr.bf16.mxu1 %v3436_v0 }
  0xd0   : > { %1739 = vmatpush1.bf16.msra.mxu1 %v3009_v56  ;;  %1932 = vmatpush1.bf16.msra.mxu0 %v3011_v57 }
  0xd1   : > { %1740 = vmatprep.subr.bf16.mxu1 %v3018_v58  ;;  %1933 = vmatprep.subr.bf16.mxu0 %v3020_v59 }
  0xd4   : > { %1741 = vmatpush1.bf16.msra.mxu1 %v3017_v1  ;;  %1934 = vmatpush1.bf16.msra.mxu0 %v3019_v2 }
  0xd5   : > { %1742 = vmatprep.subr.bf16.mxu1 %v3026_v5  ;;  %1935 = vmatprep.subr.bf16.mxu0 %v3028_v6  ;;  %v3714_v6 = vld [vmem:[#allocation8 + $0x50] sm:$0xff] }
  0xd6   : > { %648 = vmatmul.mubr.bf16.gmra.mrb[24].mxu0 %v3214_v3  ;;  %728 = vmatmul.mubr.bf16.gmra.mrb[24].mxu1 %v3222_v4 }
  0xd7   : > { %657 = vmatprep.mubr.bf16.mxu0 %v3436_v0  ;;  %737 = vmatprep.mubr.bf16.mxu1 %v3436_v0  ;;  %v3044_v0 = vcombine.high %v1021_v21, %v1025_v23 }
  0xd8   : > { %1743 = vmatpush1.bf16.msra.mxu1 %v3025_v11  ;;  %1936 = vmatpush1.bf16.msra.mxu0 %v3027_v12  ;;  %v919_v11 = vld [vmem:[#allocation8 + $0x58] sm:$0xff] }
  0xd9   : > { %1744 = vmatprep.subr.bf16.mxu1 %v3034_v13  ;;  %1937 = vmatprep.subr.bf16.mxu0 %v3036_v14  ;;  %v923_v12 = vld [vmem:[#allocation8 + $0x78] sm:$0xff] }
  0xda   : > { %v2944_v23 = vcombine.high %v919_v11, %v923_v12  ;;  %v2943_v42 = vcombine.low %v919_v11, %v923_v12 }
  0xdc   : > { %1745 = vmatpush1.bf16.msra.mxu1 %v3033_v15  ;;  %1938 = vmatpush1.bf16.msra.mxu0 %v3035_v16 }
  0xdd   : > { %1746 = vmatprep.subr.bf16.mxu1 %v3042_v22  ;;  %1939 = vmatprep.subr.bf16.mxu0 %v3044_v0  ;;  %v2942_v22 = vcombine.high %v3714_v6, %v922_v10 }
  0xde   : > { %658 = vmatmul.mubr.bf16.gmra.mrb[28].mxu0 %v3215_v17  ;;  %738 = vmatmul.mubr.bf16.gmra.mrb[28].mxu1 %v3223_v18 }
  0xe0   : > { %1747 = vmatpush1.bf16.msra.mxu1 %v3041_v24  ;;  %1940 = vmatpush1.bf16.msra.mxu0 %v3043_v25  ;;  %v3726_v24 = vld [vmem:[#allocation8 + $0x90] sm:$0xff] }
  0xe1   : > { %1748 = vmatprep.subr.bf16.mxu1 %v3050_v29  ;;  %1941 = vmatprep.subr.bf16.mxu0 %v3052_v33  ;;  %v3728_v25 = vld [vmem:[#allocation8 + $0xb0] sm:$0xff]  ;;  %v2941_v29 = vcombine.low %v3714_v6, %v922_v10 }
  0xe2   : > { %v3783_v10 = vld [vmem:[#allocation8 + $0x130] sm:$0xff] }
  0xe4   : > { %1749 = vmatpush1.bf16.msra.mxu1 %v3049_v31  ;;  %1942 = vmatpush1.bf16.msra.mxu0 %v3051_v32  ;;  %v3737_v31 = vld [vmem:[#allocation8 + $0xb8] sm:$0xff] }
  0xe5   : > { %2104 = vmatprep.subr.bf16.mxu1 %v2934_v37  ;;  %2297 = vmatprep.subr.bf16.mxu0 %v2936_v41 }
 0x179   : > { %v589_v49 = vpop.f32.mrb[0].mxu0  ;;  %v669_v50 = vpop.f32.mrb[0].mxu1 }
 0x17a   : > { %v590_v51 = vadd.f32 %v589_v49, %v3700_v47  ;;  %v591_v52 = vpop.f32.mrb[1].mxu0  ;;  %v670_v53 = vadd.f32 %v669_v50, %v3700_v47  ;;  %v671_v54 = vpop.f32.mrb[1].mxu1 }
 0x17b   : > { %v592_v55 = vadd.f32 %v591_v52, %v3704_v48  ;;  %v593_v56 = vpop.f32.mrb[2].mxu0  ;;  %v672_v57 = vadd.f32 %v671_v54, %v3704_v48  ;;  %v673_v58 = vpop.f32.mrb[2].mxu1  ;;  %v2950_v52 = vcombine.high %v3726_v24, %v3728_v25 }
 0x17c   : > { %v594_v59 = vadd.f32 %v593_v56, %v3700_v47  ;;  %v595_v60 = vpop.f32.mrb[3].mxu0  ;;  %v780_v61 = vmax.f32 %v670_v53, 0.0  ;;  %v674_v62 = vadd.f32 %v673_v58, %v3700_v47  ;;  %v675_v63 = vpop.f32.mrb[3].mxu1  ;;  %v748_v4 = vmax.f32 %v590_v51, 0.0  ;;  %v3756_v58 = vld [vmem:[#allocation8 + $0xd0] sm:$0xff] }
 0x17d   : > { %v596_v1 = vadd.f32 %v595_v60, %v3704_v48  ;;  %v781_v2 = vmax.f32 %v672_v57, 0.0  ;;  %v676_v3 = vadd.f32 %v675_v63, %v3704_v48  ;;  %v749_v8 = vmax.f32 %v592_v55, 0.0 }
 0x17e   : > { %v750_v5 = vmax.f32 %v594_v59, 0.0  ;;  %v782_v7 = vmax.f32 %v674_v62, 0.0  ;;  %v2952_v57 = vcombine.high %v3735_v30, %v3737_v31  ;;  %v2951_v62 = vcombine.low %v3735_v30, %v3737_v31 }
 0x17f   : > { %v751_v9 = vmax.f32 %v596_v1, 0.0  ;;  %v783_v13 = vmax.f32 %v676_v3, 0.0  ;;  %v2958_v3 = vcombine.high %v3756_v58, %v3758_v34 }
 0x180   : > { %v3716_v14 = vpack.c.bf16 %v750_v5, %v748_v4  ;;  %v3718_v15 = vpack.c.bf16 %v782_v7, %v780_v61  ;;  %v2949_v61 = vcombine.low %v3726_v24, %v3728_v25 }
 0x181   : > { %v3720_v16 = vpack.c.bf16 %v751_v9, %v749_v8  ;;  %v599_v17 = vpop.f32.mrb[4].mxu0  ;;  %v3722_v18 = vpack.c.bf16 %v783_v13, %v781_v2  ;;  %v679_v19 = vpop.f32.mrb[4].mxu1  ;;  %v3781_v9 = vld [vmem:[#allocation8 + $0x110] sm:$0xff] }
 0x182   : > { %v600_v20 = vadd.f32 %v599_v17, %v3700_v47  ;;  %v601_v21 = vpop.f32.mrb[5].mxu0  ;;  %v680_v0 = vadd.f32 %v679_v19, %v3700_v47  ;;  %v681_v26 = vpop.f32.mrb[5].mxu1  ;;  %v2957_v19 = vcombine.low %v3756_v58, %v3758_v34  ;;  %v2966_v30 = vcombine.high %v3781_v9, %v3783_v10 }
 0x183   : > { %v602_v27 = vadd.f32 %v601_v21, %v3704_v48  ;;  %v603_v28 = vpop.f32.mrb[6].mxu0  ;;  %1750 = vmatprep.mubr.bf16.mxu1 %v3720_v16  ;;  %1943 = vmatprep.mubr.bf16.mxu0 %v3720_v16  ;;  %v682_v32 = vadd.f32 %v681_v26, %v3704_v48  ;;  %v683_v33 = vpop.f32.mrb[6].mxu1  ;;  %v3793_v21 = vld [vmem:[#allocation8 + $0x138] sm:$0xff] }
 0x184   : > { %v604_v37 = vadd.f32 %v603_v28, %v3700_v47  ;;  %v605_v41 = vpop.f32.mrb[7].mxu0  ;;  %1751 = vmatmul.mubr.bf16.vlgmr.msra.gmra.mrb[32].mxu1 %v3716_v14  ;;  %1944 = vmatmul.mubr.bf16.vlgmr.msra.gmra.mrb[32].mxu0 %v3716_v14  ;;  %v784_v45 = vmax.f32 %v680_v0, 0.0  ;;  %v684_v49 = vadd.f32 %v683_v33, %v3700_v47  ;;  %v685_v50 = vpop.f32.mrb[7].mxu1  ;;  %v752_v55 = vmax.f32 %v600_v20, 0.0  ;;  %v3791_v20 = vld [vmem:[#allocation8 + $0x118] sm:$0xff] }
 0x185   : > { %v606_v51 = vadd.f32 %v605_v41, %v3704_v48  ;;  %2105 = vmatpush1.bf16.msra.mxu1 %v2933_v36  ;;  %2298 = vmatpush1.bf16.msra.mxu0 %v2935_v40  ;;  %v785_v53 = vmax.f32 %v682_v32, 0.0  ;;  %v686_v54 = vadd.f32 %v685_v50, %v3704_v48  ;;  %v753_v36 = vmax.f32 %v602_v27, 0.0  ;;  %v3762_v40 = vld [vmem:[#allocation8 + $0xf8] sm:$0xff] }
 0x186   : > { %v754_v56 = vmax.f32 %v604_v37, 0.0  ;;  %2106 = vmatprep.subr.bf16.mxu1 %v2942_v22  ;;  %2299 = vmatprep.subr.bf16.mxu0 %v2944_v23  ;;  %v786_v35 = vmax.f32 %v684_v49, 0.0  ;;  %v2960_v8 = vcombine.high %v3760_v39, %v3762_v40  ;;  %v2959_v0 = vcombine.low %v3760_v39, %v3762_v40 }
 0x187   : > { %v755_v38 = vmax.f32 %v606_v51, 0.0  ;;  %v787_v59 = vmax.f32 %v686_v54, 0.0  ;;  %v2968_v41 = vcombine.high %v3791_v20, %v3793_v21 }
 0x188   : > { %v3764_v60 = vpack.c.bf16 %v754_v56, %v752_v55  ;;  %v3770_v63 = vpack.c.bf16 %v786_v35, %v784_v45  ;;  %v3810_v45 = vld [vmem:[#allocation8 + $0x170] sm:$0xff]  ;;  %v2965_v56 = vcombine.low %v3781_v9, %v3783_v10  ;;  %v3843_v9 = vld [vmem:[#allocation8 + $0x198] sm:$0xff] }
 0x189   : > { %v3772_v1 = vpack.c.bf16 %v755_v38, %v753_v36  ;;  %v609_v2 = vpop.f32.mrb[8].mxu0  ;;  %2107 = vmatpush1.bf16.msra.mxu1 %v2941_v29  ;;  %2300 = vmatpush1.bf16.msra.mxu0 %v2943_v42  ;;  %v3776_v4 = vpack.c.bf16 %v787_v59, %v785_v53  ;;  %v689_v5 = vpop.f32.mrb[8].mxu1  ;;  %v3808_v42 = vld [vmem:[#allocation8 + $0x150] sm:$0xff]  ;;  %v3814_v53 = vld [vmem:[#allocation8 + $0x178] sm:$0xff] }
 0x18a   : > { %v610_v6 = vadd.f32 %v609_v2, %v3700_v47  ;;  %v611_v7 = vpop.f32.mrb[9].mxu0  ;;  %2108 = vmatprep.subr.bf16.mxu1 %v2950_v52  ;;  %2301 = vmatprep.subr.bf16.mxu0 %v2952_v57  ;;  %v690_v11 = vadd.f32 %v689_v5, %v3700_v47  ;;  %v691_v12 = vpop.f32.mrb[9].mxu1  ;;  %v3812_v52 = vld [vmem:[#allocation8 + $0x158] sm:$0xff]  ;;  %v2967_v57 = vcombine.low %v3791_v20, %v3793_v21  ;;  %v3835_v2 = vld [vmem:[#allocation8 + $0x1b0] sm:$0xff] }
 0x18b   : > { %v612_v13 = vadd.f32 %v611_v7, %v3704_v48  ;;  %v613_v17 = vpop.f32.mrb[10].mxu0  ;;  %1760 = vmatprep.mubr.bf16.mxu1 %v3772_v1  ;;  %1953 = vmatprep.mubr.bf16.mxu0 %v3772_v1  ;;  %v692_v22 = vadd.f32 %v691_v12, %v3704_v48  ;;  %v693_v23 = vpop.f32.mrb[10].mxu1  ;;  %v2974_v36 = vcombine.high %v3808_v42, %v3810_v45  ;;  %v3845_v10 = vld [vmem:[#allocation8 + $0x1b8] sm:$0xff] }
 0x18c   : > { %v614_v24 = vadd.f32 %v613_v17, %v3700_v47  ;;  %v615_v25 = vpop.f32.mrb[11].mxu0  ;;  %1761 = vmatmul.mubr.bf16.gmra.mrb[36].mxu1 %v3764_v60  ;;  %1954 = vmatmul.mubr.bf16.gmra.mrb[36].mxu0 %v3764_v60  ;;  %v788_v26 = vmax.f32 %v690_v11, 0.0  ;;  %v694_v27 = vadd.f32 %v693_v23, %v3700_v47  ;;  %v695_v28 = vpop.f32.mrb[11].mxu1  ;;  %v756_v33 = vmax.f32 %v610_v6, 0.0 }
 0x18d   : > { %v616_v29 = vadd.f32 %v615_v25, %v3704_v48  ;;  %2109 = vmatpush1.bf16.msra.mxu1 %v2949_v61  ;;  %2302 = vmatpush1.bf16.msra.mxu0 %v2951_v62  ;;  %v789_v31 = vmax.f32 %v692_v22, 0.0  ;;  %v696_v32 = vadd.f32 %v695_v28, %v3704_v48  ;;  %v757_v50 = vmax.f32 %v612_v13, 0.0  ;;  %v3833_v62 = vld [vmem:[#allocation8 + $0x190] sm:$0xff] }
 0x18e   : > { %v758_v37 = vmax.f32 %v614_v24, 0.0  ;;  %2110 = vmatprep.subr.bf16.mxu1 %v2958_v3  ;;  %2303 = vmatprep.subr.bf16.mxu0 %v2960_v8  ;;  %v790_v49 = vmax.f32 %v694_v27, 0.0  ;;  %v2976_v61 = vcombine.high %v3812_v52, %v3814_v53  ;;  %v2973_v8 = vcombine.low %v3808_v42, %v3810_v45 }
 0x18f   : > { %v759_v51 = vmax.f32 %v616_v29, 0.0  ;;  %v791_v54 = vmax.f32 %v696_v32, 0.0  ;;  %v2982_v24 = vcombine.high %v3833_v62, %v3835_v2  ;;  %v2984_v28 = vcombine.high %v3843_v9, %v3845_v10  ;;  %v3860_v29 = vld [vmem:[#allocation8 + $0x1d0] sm:$0xff] }
 0x190   : > { %v3816_v55 = vpack.c.bf16 %v758_v37, %v756_v33  ;;  %v3822_v58 = vpack.c.bf16 %v790_v49, %v788_v26  ;;  %v3864_v37 = vld [vmem:[#allocation8 + $0x1d8] sm:$0xff]  ;;  %v2981_v49 = vcombine.low %v3833_v62, %v3835_v2 }
 0x191   : > { %v3824_v34 = vpack.c.bf16 %v759_v51, %v757_v50  ;;  %v619_v35 = vpop.f32.mrb[12].mxu0  ;;  %2111 = vmatpush1.bf16.msra.mxu1 %v2957_v19  ;;  %2304 = vmatpush1.bf16.msra.mxu0 %v2959_v0  ;;  %v3828_v38 = vpack.c.bf16 %v791_v54, %v789_v31  ;;  %v699_v39 = vpop.f32.mrb[12].mxu1  ;;  %v2975_v19 = vcombine.low %v3812_v52, %v3814_v53 }
 0x192   : > { %v620_v40 = vadd.f32 %v619_v35, %v3700_v47  ;;  %v621_v59 = vpop.f32.mrb[13].mxu0  ;;  %2112 = vmatprep.subr.bf16.mxu1 %v2966_v30  ;;  %2305 = vmatprep.subr.bf16.mxu0 %v2968_v41  ;;  %v700_v3 = vadd.f32 %v699_v39, %v3700_v47  ;;  %v701_v5 = vpop.f32.mrb[13].mxu1  ;;  %v3862_v30 = vld [vmem:[#allocation8 + $0x1f0] sm:$0xff]  ;;  %v3866_v41 = vld [vmem:[#allocation8 + $0x1f8] sm:$0xff]  ;;  %v2983_v50 = vcombine.low %v3843_v9, %v3845_v10 }
 0x193   : > { %v622_v6 = vadd.f32 %v621_v59, %v3704_v48  ;;  %v623_v7 = vpop.f32.mrb[14].mxu0  ;;  %1770 = vmatprep.mubr.bf16.mxu1 %v3824_v34  ;;  %1963 = vmatprep.mubr.bf16.mxu0 %v3824_v34  ;;  %v702_v11 = vadd.f32 %v701_v5, %v3704_v48  ;;  %v703_v12 = vpop.f32.mrb[14].mxu1  ;;  %v2990_v54 = vcombine.high %v3860_v29, %v3862_v30  ;;  %v3887_v59 = vld [vmem:[#allocation8 + $0x230] sm:$0xff] }
 0x194   : > { %v624_v13 = vadd.f32 %v623_v7, %v3700_v47  ;;  %v625_v17 = vpop.f32.mrb[15].mxu0  ;;  %1771 = vmatmul.mubr.bf16.gmra.mrb[40].mxu1 %v3816_v55  ;;  %1964 = vmatmul.mubr.bf16.gmra.mrb[40].mxu0 %v3816_v55  ;;  %v792_v20 = vmax.f32 %v700_v3, 0.0  ;;  %v704_v21 = vadd.f32 %v703_v12, %v3700_v47  ;;  %v705_v22 = vpop.f32.mrb[15].mxu1  ;;  %v760_v26 = vmax.f32 %v620_v40, 0.0  ;;  %v3885_v40 = vld [vmem:[#allocation8 + $0x210] sm:$0xff]  ;;  %v3897_v7 = vld [vmem:[#allocation8 + $0x238] sm:$0xff] }
 0x195   : > { %v626_v23 = vadd.f32 %v625_v17, %v3704_v48  ;;  %2113 = vmatpush1.bf16.msra.mxu1 %v2965_v56  ;;  %2306 = vmatpush1.bf16.msra.mxu0 %v2967_v57  ;;  %v793_v25 = vmax.f32 %v702_v11, 0.0  ;;  %v706_v0 = vadd.f32 %v705_v22, %v3704_v48  ;;  %v761_v32 = vmax.f32 %v622_v6, 0.0  ;;  %v3895_v6 = vld [vmem:[#allocation8 + $0x218] sm:$0xff] }
 0x196   : > { %v762_v27 = vmax.f32 %v624_v13, 0.0  ;;  %2114 = vmatprep.subr.bf16.mxu1 %v2974_v36  ;;  %2307 = vmatprep.subr.bf16.mxu0 %v2976_v61  ;;  %v794_v31 = vmax.f32 %v704_v21, 0.0  ;;  %v2992_v39 = vcombine.high %v3864_v37, %v3866_v41  ;;  %v2989_v5 = vcombine.low %v3860_v29, %v3862_v30 }
 0x197   : > { %v763_v33 = vmax.f32 %v626_v23, 0.0  ;;  %v795_v42 = vmax.f32 %v706_v0, 0.0  ;;  %v2991_v12 = vcombine.low %v3864_v37, %v3866_v41  ;;  %v2998_v21 = vcombine.high %v3885_v40, %v3887_v59 }
 0x198   : > { %v3868_v45 = vpack.c.bf16 %v762_v27, %v760_v26  ;;  %v3874_v51 = vpack.c.bf16 %v794_v31, %v792_v20  ;;  %v3000_v0 = vcombine.high %v3895_v6, %v3897_v7  ;;  %v3912_v26 = vld [vmem:[#allocation8 + $0x250] sm:$0xff]  ;;  %v3916_v31 = vld [vmem:[#allocation8 + $0x258] sm:$0xff]  ;;  %v2997_v41 = vcombine.low %v3885_v40, %v3887_v59 }
 0x199   : > { %v3876_v52 = vpack.c.bf16 %v763_v33, %v761_v32  ;;  %v629_v53 = vpop.f32.mrb[16].mxu0  ;;  %2115 = vmatpush1.bf16.msra.mxu1 %v2973_v8  ;;  %2308 = vmatpush1.bf16.msra.mxu0 %v2975_v19  ;;  %v3880_v56 = vpack.c.bf16 %v795_v42, %v793_v25  ;;  %v709_v57 = vpop.f32.mrb[16].mxu1  ;;  %v3914_v27 = vld [vmem:[#allocation8 + $0x270] sm:$0xff]  ;;  %v3918_v32 = vld [vmem:[#allocation8 + $0x278] sm:$0xff]  ;;  %v2999_v42 = vcombine.low %v3895_v6, %v3897_v7 }
 0x19a   : > { %v630_v35 = vadd.f32 %v629_v53, %v3700_v47  ;;  %v631_v36 = vpop.f32.mrb[17].mxu0  ;;  %2116 = vmatprep.subr.bf16.mxu1 %v2982_v24  ;;  %2309 = vmatprep.subr.bf16.mxu0 %v2984_v28  ;;  %v710_v61 = vadd.f32 %v709_v57, %v3700_v47  ;;  %v711_v62 = vpop.f32.mrb[17].mxu1  ;;  %v3008_v40 = vcombine.high %v3916_v31, %v3918_v32  ;;  %v3937_v59 = vld [vmem:[#allocation8 + $0x290] sm:$0xff]  ;;  %v3947_v7 = vld [vmem:[#allocation8 + $0x298] sm:$0xff] }
 0x19b   : > { %v632_v2 = vadd.f32 %v631_v36, %v3704_v48  ;;  %v633_v3 = vpop.f32.mrb[18].mxu0  ;;  %1780 = vmatprep.mubr.bf16.mxu1 %v3876_v52  ;;  %1973 = vmatprep.mubr.bf16.mxu0 %v3876_v52  ;;  %v712_v8 = vadd.f32 %v711_v62, %v3704_v48  ;;  %v713_v9 = vpop.f32.mrb[18].mxu1  ;;  %v3005_v6 = vcombine.low %v3912_v26, %v3914_v27 }
 0x19c   : > { %v634_v10 = vadd.f32 %v633_v3, %v3700_v47  ;;  %v635_v11 = vpop.f32.mrb[19].mxu0  ;;  %1781 = vmatmul.mubr.bf16.gmra.mrb[44].mxu1 %v3868_v45  ;;  %1974 = vmatmul.mubr.bf16.gmra.mrb[44].mxu0 %v3868_v45  ;;  %v796_v13 = vmax.f32 %v710_v61, 0.0  ;;  %v714_v17 = vadd.f32 %v713_v9, %v3700_v47  ;;  %v715_v19 = vpop.f32.mrb[19].mxu1  ;;  %v764_v24 = vmax.f32 %v630_v35, 0.0  ;;  %v3939_v61 = vld [vmem:[#allocation8 + $0x2b0] sm:$0xff] }
 0x19d   : > { %v636_v20 = vadd.f32 %v635_v11, %v3704_v48  ;;  %2117 = vmatpush1.bf16.msra.mxu1 %v2981_v49  ;;  %2310 = vmatpush1.bf16.msra.mxu0 %v2983_v50  ;;  %v797_v22 = vmax.f32 %v712_v8, 0.0  ;;  %v716_v23 = vadd.f32 %v715_v19, %v3704_v48  ;;  %v765_v29 = vmax.f32 %v632_v2, 0.0  ;;  %v3949_v8 = vld [vmem:[#allocation8 + $0x2b8] sm:$0xff] }
 0x19e   : > { %v766_v25 = vmax.f32 %v634_v10, 0.0  ;;  %2118 = vmatprep.subr.bf16.mxu1 %v2990_v54  ;;  %2311 = vmatprep.subr.bf16.mxu0 %v2992_v39  ;;  %v798_v28 = vmax.f32 %v714_v17, 0.0  ;;  %v3006_v54 = vcombine.high %v3912_v26, %v3914_v27  ;;  %v3016_v26 = vcombine.high %v3947_v7, %v3949_v8  ;;  %v3964_v27 = vld [vmem:[#allocation8 + $0x2d0] sm:$0xff] }
 0x19f   : > { %v767_v30 = vmax.f32 %v636_v20, 0.0  ;;  %v799_v33 = vmax.f32 %v716_v23, 0.0 }
 0x1a0   : > { %v3920_v37 = vpack.c.bf16 %v766_v25, %v764_v24  ;;  %v3926_v49 = vpack.c.bf16 %v798_v28, %v796_v13  ;;  %v3007_v13 = vcombine.low %v3916_v31, %v3918_v32  ;;  %v3966_v28 = vld [vmem:[#allocation8 + $0x2f0] sm:$0xff]  ;;  %v3968_v32 = vld [vmem:[#allocation8 + $0x2d8] sm:$0xff] }
 0x1a1   : > { %v3928_v50 = vpack.c.bf16 %v767_v30, %v765_v29  ;;  %v639_v53 = vpop.f32.mrb[20].mxu0  ;;  %2119 = vmatpush1.bf16.msra.mxu1 %v2989_v5  ;;  %2312 = vmatpush1.bf16.msra.mxu0 %v2991_v12  ;;  %v3932_v57 = vpack.c.bf16 %v799_v33, %v797_v22  ;;  %v719_v35 = vpop.f32.mrb[20].mxu1  ;;  %v3014_v22 = vcombine.high %v3937_v59, %v3939_v61  ;;  %v3970_v33 = vld [vmem:[#allocation8 + $0x2f8] sm:$0xff] }
 0x1a2   : > { %v640_v36 = vadd.f32 %v639_v53, %v3700_v47  ;;  %v641_v39 = vpop.f32.mrb[21].mxu0  ;;  %2120 = vmatprep.subr.bf16.mxu1 %v2998_v21  ;;  %2313 = vmatprep.subr.bf16.mxu0 %v3000_v0  ;;  %v720_v62 = vadd.f32 %v719_v35, %v3700_v47  ;;  %v721_v2 = vpop.f32.mrb[21].mxu1  ;;  %v3013_v53 = vcombine.low %v3937_v59, %v3939_v61  ;;  %v3989_v61 = vld [vmem:[#allocation8 + $0x310] sm:$0xff] }
 0x1a3   : > { %v642_v3 = vadd.f32 %v641_v39, %v3704_v48  ;;  %v643_v5 = vpop.f32.mrb[22].mxu0  ;;  %1790 = vmatprep.mubr.bf16.mxu1 %v3928_v50  ;;  %1983 = vmatprep.mubr.bf16.mxu0 %v3928_v50  ;;  %v722_v9 = vadd.f32 %v721_v2, %v3704_v48  ;;  %v723_v10 = vpop.f32.mrb[22].mxu1  ;;  %v3024_v59 = vcombine.high %v3968_v32, %v3970_v33 }
 0x1a4   : > { %v644_v11 = vadd.f32 %v643_v5, %v3700_v47  ;;  %v645_v12 = vpop.f32.mrb[23].mxu0  ;;  %1791 = vmatmul.mubr.bf16.gmra.mrb[48].mxu1 %v3920_v37  ;;  %1984 = vmatmul.mubr.bf16.gmra.mrb[48].mxu0 %v3920_v37  ;;  %v800_v17 = vmax.f32 %v720_v62, 0.0  ;;  %v724_v19 = vadd.f32 %v723_v10, %v3700_v47  ;;  %v725_v20 = vpop.f32.mrb[23].mxu1  ;;  %v768_v25 = vmax.f32 %v640_v36, 0.0 }
 0x1a5   : > { %v646_v21 = vadd.f32 %v645_v12, %v3704_v48  ;;  %2121 = vmatpush1.bf16.msra.mxu1 %v2997_v41  ;;  %2314 = vmatpush1.bf16.msra.mxu0 %v2999_v42  ;;  %v801_v23 = vmax.f32 %v722_v9, 0.0  ;;  %v726_v24 = vadd.f32 %v725_v20, %v3704_v48  ;;  %v769_v30 = vmax.f32 %v642_v3, 0.0  ;;  %v3999_v12 = vld [vmem:[#allocation8 + $0x318] sm:$0xff] }
 0x1a6   : > { %v770_v0 = vmax.f32 %v644_v11, 0.0  ;;  %2122 = vmatprep.subr.bf16.mxu1 %v3006_v54  ;;  %2315 = vmatprep.subr.bf16.mxu0 %v3008_v40  ;;  %v802_v29 = vmax.f32 %v724_v19, 0.0  ;;  %v3015_v54 = vcombine.low %v3947_v7, %v3949_v8  ;;  %v3022_v40 = vcombine.high %v3964_v27, %v3966_v28  ;;  %v3991_v7 = vld [vmem:[#allocation8 + $0x330] sm:$0xff] }
 0x1a7   : > { %v771_v31 = vmax.f32 %v646_v21, 0.0  ;;  %v803_v41 = vmax.f32 %v726_v24, 0.0  ;;  %v3021_v11 = vcombine.low %v3964_v27, %v3966_v28 }
 0x1a8   : > { %v3972_v42 = vpack.c.bf16 %v770_v0, %v768_v25  ;;  %v3978_v35 = vpack.c.bf16 %v802_v29, %v800_v17 }
 0x1a9   : > { %v3980_v36 = vpack.c.bf16 %v771_v31, %v769_v30  ;;  %v649_v39 = vpop.f32.mrb[24].mxu0  ;;  %2123 = vmatpush1.bf16.msra.mxu1 %v3005_v6  ;;  %2316 = vmatpush1.bf16.msra.mxu0 %v3007_v13  ;;  %v3984_v62 = vpack.c.bf16 %v803_v41, %v801_v23  ;;  %v729_v2 = vpop.f32.mrb[24].mxu1  ;;  %v4001_v13 = vld [vmem:[#allocation8 + $0x338] sm:$0xff]  ;;  %v4018_v41 = vld [vmem:[#allocation8 + $0x370] sm:$0xff] }
 0x1aa   : > { %v650_v3 = vadd.f32 %v649_v39, %v3700_v47  ;;  %v651_v5 = vpop.f32.mrb[25].mxu0  ;;  %2124 = vmatprep.subr.bf16.mxu1 %v3014_v22  ;;  %2317 = vmatprep.subr.bf16.mxu0 %v3016_v26  ;;  %v730_v6 = vadd.f32 %v729_v2, %v3700_v47  ;;  %v731_v8 = vpop.f32.mrb[25].mxu1  ;;  %v3023_v22 = vcombine.low %v3968_v32, %v3970_v33  ;;  %v4016_v33 = vld [vmem:[#allocation8 + $0x350] sm:$0xff]  ;;  %v1015_v2 = vld [vmem:[#allocation8 + $0x358] sm:$0xff] }
 0x1ab   : > { %v652_v9 = vadd.f32 %v651_v5, %v3704_v48  ;;  %v653_v10 = vpop.f32.mrb[26].mxu0  ;;  %1800 = vmatprep.mubr.bf16.mxu1 %v3980_v36  ;;  %1993 = vmatprep.mubr.bf16.mxu0 %v3980_v36  ;;  %v732_v17 = vadd.f32 %v731_v8, %v3704_v48  ;;  %v733_v19 = vpop.f32.mrb[26].mxu1  ;;  %v3030_v26 = vcombine.high %v3989_v61, %v3991_v7  ;;  %v1019_v5 = vld [vmem:[#allocation8 + $0x378] sm:$0xff] }
 0x1ac   : > { %v654_v20 = vadd.f32 %v653_v10, %v3700_v47  ;;  %v655_v21 = vpop.f32.mrb[27].mxu0  ;;  %1801 = vmatmul.mubr.bf16.gmra.mrb[52].mxu1 %v3972_v42  ;;  %1994 = vmatmul.mubr.bf16.gmra.mrb[52].mxu0 %v3972_v42  ;;  %v804_v23 = vmax.f32 %v730_v6, 0.0  ;;  %v734_v24 = vadd.f32 %v733_v19, %v3700_v47  ;;  %v735_v25 = vpop.f32.mrb[27].mxu1  ;;  %v772_v29 = vmax.f32 %v650_v3, 0.0 }
 0x1ad   : > { %v656_v0 = vadd.f32 %v655_v21, %v3704_v48  ;;  %2125 = vmatpush1.bf16.msra.mxu1 %v3013_v53  ;;  %2318 = vmatpush1.bf16.msra.mxu0 %v3015_v54  ;;  %v805_v27 = vmax.f32 %v732_v17, 0.0  ;;  %v736_v28 = vadd.f32 %v735_v25, %v3704_v48  ;;  %v3032_v31 = vcombine.high %v3999_v12, %v4001_v13 }
 0x1ae   : > { %v774_v30 = vmax.f32 %v654_v20, 0.0  ;;  %2126 = vmatprep.subr.bf16.mxu1 %v3022_v40  ;;  %2319 = vmatprep.subr.bf16.mxu0 %v3024_v59  ;;  %v806_v32 = vmax.f32 %v734_v24, 0.0  ;;  %v773_v53 = vmax.f32 %v652_v9, 0.0  ;;  %v3029_v3 = vcombine.low %v3989_v61, %v3991_v7 }
 0x1af   : > { %v775_v54 = vmax.f32 %v656_v0, 0.0  ;;  %v807_v39 = vmax.f32 %v736_v28, 0.0  ;;  %v3031_v40 = vcombine.low %v3999_v12, %v4001_v13  ;;  %v3038_v17 = vcombine.high %v4016_v33, %v4018_v41  ;;  %v1022_v13 = vld [vmem:[#allocation8 + $0x390] sm:$0xff] }
 0x1b0   : > { %v4020_v6 = vpack.c.bf16 %v774_v30, %v772_v29  ;;  %v4026_v59 = vpack.c.bf16 %v806_v32, %v804_v23  ;;  %v3040_v61 = vcombine.high %v1015_v2, %v1019_v5  ;;  %v1026_v23 = vld [vmem:[#allocation8 + $0x3b0] sm:$0xff]  ;;  %v3037_v24 = vcombine.low %v4016_v33, %v4018_v41 }
 0x1b1   : > { %v4028_v8 = vpack.c.bf16 %v775_v54, %v773_v53  ;;  %v659_v10 = vpop.f32.mrb[28].mxu0  ;;  %2127 = vmatpush1.bf16.msra.mxu1 %v3021_v11  ;;  %2320 = vmatpush1.bf16.msra.mxu0 %v3023_v22  ;;  %v4030_v9 = vpack.c.bf16 %v807_v39, %v805_v27  ;;  %v739_v19 = vpop.f32.mrb[28].mxu1  ;;  %v1027_v27 = vld [vmem:[#allocation8 + $0x3b8] sm:$0xff]  ;;  %v3039_v30 = vcombine.low %v1015_v2, %v1019_v5 }
 0x1b2   : > { %v660_v20 = vadd.f32 %v659_v10, %v3700_v47  ;;  %v661_v21 = vpop.f32.mrb[29].mxu0  ;;  %2128 = vmatprep.subr.bf16.mxu1 %v3030_v26  ;;  %2321 = vmatprep.subr.bf16.mxu0 %v3032_v31  ;;  %v740_v7 = vadd.f32 %v739_v19, %v3700_v47  ;;  %v741_v12 = vpop.f32.mrb[29].mxu1  ;;  %v1023_v26 = vld [vmem:[#allocation8 + $0x398] sm:$0xff]  ;;  %v3046_v39 = vcombine.high %v1022_v13, %v1026_v23 }
 0x1b3   : > { %v662_v11 = vadd.f32 %v661_v21, %v3704_v48  ;;  %v663_v22 = vpop.f32.mrb[30].mxu0  ;;  %1810 = vmatprep.mubr.bf16.mxu1 %v4028_v8  ;;  %2003 = vmatprep.mubr.bf16.mxu0 %v4028_v8  ;;  %v742_v25 = vadd.f32 %v741_v12, %v3704_v48  ;;  %v743_v0 = vpop.f32.mrb[30].mxu1  ;;  %v3048_v12 = vcombine.high %v1023_v26, %v1027_v27 }
 0x1b4   : > { %v664_v28 = vadd.f32 %v663_v22, %v3700_v47  ;;  %v665_v29 = vpop.f32.mrb[31].mxu0  ;;  %1811 = vmatmul.mubr.bf16.gmra.mrb[56].mxu1 %v4020_v6  ;;  %2004 = vmatmul.mubr.bf16.gmra.mrb[56].mxu0 %v4020_v6  ;;  %v808_v31 = vmax.f32 %v740_v7, 0.0  ;;  %v744_v32 = vadd.f32 %v743_v0, %v3700_v47  ;;  %v745_v53 = vpop.f32.mrb[31].mxu1  ;;  %v776_v10 = vmax.f32 %v660_v20, 0.0  ;;  %v1030_v7 = vld [vmem:[#allocation8 + $0x3d0] sm:$0xff] }
 0x1b5   : > { %v666_v54 = vadd.f32 %v665_v29, %v3704_v48  ;;  %2129 = vmatpush1.bf16.msra.mxu1 %v3029_v3  ;;  %2322 = vmatpush1.bf16.msra.mxu0 %v3031_v40  ;;  %v809_v33 = vmax.f32 %v742_v25, 0.0  ;;  %v746_v41 = vadd.f32 %v745_v53, %v3704_v48  ;;  %v777_v22 = vmax.f32 %v662_v11, 0.0  ;;  %v1034_v3 = vld [vmem:[#allocation8 + $0x3f0] sm:$0xff]  ;;  %v1031_v40 = vld [vmem:[#allocation8 + $0x3d8] sm:$0xff] }
 0x1b6   : > { %v778_v19 = vmax.f32 %v664_v28, 0.0  ;;  %2130 = vmatprep.subr.bf16.mxu1 %v3038_v17  ;;  %2323 = vmatprep.subr.bf16.mxu0 %v3040_v61  ;;  %v810_v21 = vmax.f32 %v744_v32, 0.0  ;;  %v1035_v25 = vld [vmem:[#allocation8 + $0x3f8] sm:$0xff]  ;;  %v3045_v17 = vcombine.low %v1022_v13, %v1026_v23  ;;  %v3047_v20 = vcombine.low %v1023_v26, %v1027_v27 }
 0x1b7   : > { %v779_v2 = vmax.f32 %v666_v54, 0.0  ;;  %v811_v5 = vmax.f32 %v746_v41, 0.0  ;;  %v3054_v61 = vcombine.high %v1030_v7, %v1034_v3  ;;  %v3056_v11 = vcombine.high %v1031_v40, %v1035_v25 }
 0x1b8   : > { %v4048_v47 = vpack.c.bf16 %v778_v19, %v776_v10  ;;  %v4050_v0 = vpack.c.bf16 %v810_v21, %v808_v31  ;;  %v3053_v13 = vcombine.low %v1030_v7, %v1034_v3  ;;  %v3055_v23 = vcombine.low %v1031_v40, %v1035_v25 }
 0x1b9   : > { %v4052_v29 = vpack.c.bf16 %v779_v2, %v777_v22  ;;  %2131 = vmatpush1.bf16.msra.mxu1 %v3037_v24  ;;  %2324 = vmatpush1.bf16.msra.mxu0 %v3039_v30  ;;  %v4054_v48 = vpack.c.bf16 %v811_v5, %v809_v33 }
 0x1ba   : > { %2132 = vmatprep.subr.bf16.mxu1 %v3046_v39  ;;  %2325 = vmatprep.subr.bf16.mxu0 %v3048_v12 }
 0x1bb   : > { %1820 = vmatprep.mubr.bf16.mxu1 %v4052_v29  ;;  %2013 = vmatprep.mubr.bf16.mxu0 %v4052_v29 }
 0x1bc   : > { %1821 = vmatmul.mubr.bf16.gmra.mrb[60].mxu1 %v4048_v47  ;;  %2014 = vmatmul.mubr.bf16.gmra.mrb[60].mxu0 %v4048_v47 }
 0x1bd   : > { %1830 = vmatprep.mubr.bf16.mxu1 %v3722_v18  ;;  %2023 = vmatprep.mubr.bf16.mxu0 %v3722_v18 }
 0x1be   : > { %2133 = vmatpush1.bf16.msra.mxu1 %v3045_v17  ;;  %2326 = vmatpush1.bf16.msra.mxu0 %v3047_v20 }
 0x1bf   : > { %2134 = vmatprep.subr.bf16.mxu1 %v3054_v61  ;;  %2327 = vmatprep.subr.bf16.mxu0 %v3056_v11 }
 0x1c2   : > { %2135 = vmatpush1.bf16.msra.mxu1 %v3053_v13  ;;  %2328 = vmatpush1.bf16.msra.mxu0 %v3055_v23 }
 0x1c4   : > { %1831 = vmatmul.mubr.bf16.gmra.mrb[64].mxu1 %v3718_v15  ;;  %2024 = vmatmul.mubr.bf16.gmra.mrb[64].mxu0 %v3718_v15 }
 0x1c5   : > { %1840 = vmatprep.mubr.bf16.mxu1 %v3776_v4  ;;  %2033 = vmatprep.mubr.bf16.mxu0 %v3776_v4 }
 0x1cc   : > { %1841 = vmatmul.mubr.bf16.gmra.mrb[68].mxu1 %v3770_v63  ;;  %2034 = vmatmul.mubr.bf16.gmra.mrb[68].mxu0 %v3770_v63 }
 0x1cd   : > { %1850 = vmatprep.mubr.bf16.mxu1 %v3828_v38  ;;  %2043 = vmatprep.mubr.bf16.mxu0 %v3828_v38 }
 0x1d4   : > { %1851 = vmatmul.mubr.bf16.gmra.mrb[72].mxu1 %v3822_v58  ;;  %2044 = vmatmul.mubr.bf16.gmra.mrb[72].mxu0 %v3822_v58 }
 0x1d5   : > { %1860 = vmatprep.mubr.bf16.mxu1 %v3880_v56  ;;  %2053 = vmatprep.mubr.bf16.mxu0 %v3880_v56 }
 0x1dc   : > { %1861 = vmatmul.mubr.bf16.gmra.mrb[76].mxu1 %v3874_v51  ;;  %2054 = vmatmul.mubr.bf16.gmra.mrb[76].mxu0 %v3874_v51 }
 0x1dd   : > { %1870 = vmatprep.mubr.bf16.mxu1 %v3932_v57  ;;  %2063 = vmatprep.mubr.bf16.mxu0 %v3932_v57 }
 0x1e4   : > { %1871 = vmatmul.mubr.bf16.gmra.mrb[80].mxu1 %v3926_v49  ;;  %2064 = vmatmul.mubr.bf16.gmra.mrb[80].mxu0 %v3926_v49 }
 0x1e5   : > { %1880 = vmatprep.mubr.bf16.mxu1 %v3984_v62  ;;  %2073 = vmatprep.mubr.bf16.mxu0 %v3984_v62 }
 0x1ec   : > { %1881 = vmatmul.mubr.bf16.gmra.mrb[84].mxu1 %v3978_v35  ;;  %2074 = vmatmul.mubr.bf16.gmra.mrb[84].mxu0 %v3978_v35 }
 0x1ed   : > { %1890 = vmatprep.mubr.bf16.mxu1 %v4030_v9  ;;  %2083 = vmatprep.mubr.bf16.mxu0 %v4030_v9 }
 0x1f4   : > { %1891 = vmatmul.mubr.bf16.gmra.mrb[88].mxu1 %v4026_v59  ;;  %2084 = vmatmul.mubr.bf16.gmra.mrb[88].mxu0 %v4026_v59 }
 0x1f5   : > { %1900 = vmatprep.mubr.bf16.mxu1 %v4054_v48  ;;  %2093 = vmatprep.mubr.bf16.mxu0 %v4054_v48 }
 0x1fc   : > { %1901 = vmatmul.mubr.bf16.gmra.mrb[92].mxu1 %v4050_v0  ;;  %2094 = vmatmul.mubr.bf16.gmra.mrb[92].mxu0 %v4050_v0 }
 0x1fd   : > { %2136 = vmatprep.mubr.bf16.mxu1 %v3720_v16  ;;  %2329 = vmatprep.mubr.bf16.mxu0 %v3720_v16  ;;  %v1052_v16 = vsub.s32 3, %v3694_v43 }
 0x204   : > { %2137 = vmatmul.mubr.bf16.vlgmr.msra.gmra.mrb[96].mxu1 %v3716_v14  ;;  %2330 = vmatmul.mubr.bf16.vlgmr.msra.gmra.mrb[96].mxu0 %v3716_v14  ;;  %v1048_v14 = vsub.s32 2, %v3694_v43 }
 0x205   : > { %2146 = vmatprep.mubr.bf16.mxu1 %v3772_v1  ;;  %2339 = vmatprep.mubr.bf16.mxu0 %v3772_v1 }
 0x20c   : > { %2147 = vmatmul.mubr.bf16.gmra.mrb[100].mxu1 %v3764_v60  ;;  %2340 = vmatmul.mubr.bf16.gmra.mrb[100].mxu0 %v3764_v60 }
 0x20d   : > { %2156 = vmatprep.mubr.bf16.mxu1 %v3824_v34  ;;  %2349 = vmatprep.mubr.bf16.mxu0 %v3824_v34 }
 0x214   : > { %2157 = vmatmul.mubr.bf16.gmra.mrb[104].mxu1 %v3816_v55  ;;  %2350 = vmatmul.mubr.bf16.gmra.mrb[104].mxu0 %v3816_v55 }
 0x215   : > { %2166 = vmatprep.mubr.bf16.mxu1 %v3876_v52  ;;  %2359 = vmatprep.mubr.bf16.mxu0 %v3876_v52 }
 0x21c   : > { %2167 = vmatmul.mubr.bf16.gmra.mrb[108].mxu1 %v3868_v45  ;;  %2360 = vmatmul.mubr.bf16.gmra.mrb[108].mxu0 %v3868_v45 }
 0x21d   : > { %2176 = vmatprep.mubr.bf16.mxu1 %v3928_v50  ;;  %2369 = vmatprep.mubr.bf16.mxu0 %v3928_v50 }
 0x224   : > { %2177 = vmatmul.mubr.bf16.gmra.mrb[112].mxu1 %v3920_v37  ;;  %2370 = vmatmul.mubr.bf16.gmra.mrb[112].mxu0 %v3920_v37 }
 0x225   : > { %2186 = vmatprep.mubr.bf16.mxu1 %v3980_v36  ;;  %2379 = vmatprep.mubr.bf16.mxu0 %v3980_v36 }
 0x22c   : > { %2187 = vmatmul.mubr.bf16.gmra.mrb[116].mxu1 %v3972_v42  ;;  %2380 = vmatmul.mubr.bf16.gmra.mrb[116].mxu0 %v3972_v42 }
 0x22d   : > { %2196 = vmatprep.mubr.bf16.mxu1 %v4028_v8  ;;  %2389 = vmatprep.mubr.bf16.mxu0 %v4028_v8 }
 0x234   : > { %2197 = vmatmul.mubr.bf16.gmra.mrb[120].mxu1 %v4020_v6  ;;  %2390 = vmatmul.mubr.bf16.gmra.mrb[120].mxu0 %v4020_v6 }
 0x235   : > { %2206 = vmatprep.mubr.bf16.mxu1 %v4052_v29  ;;  %2399 = vmatprep.mubr.bf16.mxu0 %v4052_v29 }
 0x23c   : > { %2207 = vmatmul.mubr.bf16.gmra.mrb[124].mxu1 %v4048_v47  ;;  %2400 = vmatmul.mubr.bf16.gmra.mrb[124].mxu0 %v4048_v47 }
 0x23d   : > { %2216 = vmatprep.mubr.bf16.mxu1 %v3722_v18  ;;  %2409 = vmatprep.mubr.bf16.mxu0 %v3722_v18  ;;  %v4137_v18 = vld [vmem:[#allocation9] sm:$0xff] }
 0x23e   : > { %v4149_v60 = vrot.slane %v4137_v18, %v1048_v14  ;;  %v4159_v1 = vrot.slane %v4137_v18, %v1052_v16 }
 0x244   : > { %2217 = vmatmul.mubr.bf16.gmra.mrb[128].mxu1 %v3718_v15  ;;  %2410 = vmatmul.mubr.bf16.gmra.mrb[128].mxu0 %v3718_v15  ;;  %v4146_v15 = vrot.slane %v4137_v18, %v371_v44 }
 0x245   : > { %2226 = vmatprep.mubr.bf16.mxu1 %v3776_v4  ;;  %2419 = vmatprep.mubr.bf16.mxu0 %v3776_v4 }
 0x24c   : > { %2227 = vmatmul.mubr.bf16.gmra.mrb[132].mxu1 %v3770_v63  ;;  %2420 = vmatmul.mubr.bf16.gmra.mrb[132].mxu0 %v3770_v63  ;;  %v4156_v63 = vrot.slane %v4137_v18, %v375_v46 }
 0x24d   : > { %2236 = vmatprep.mubr.bf16.mxu1 %v3828_v38  ;;  %2429 = vmatprep.mubr.bf16.mxu0 %v3828_v38 }
 0x254   : > { %2237 = vmatmul.mubr.bf16.gmra.mrb[136].mxu1 %v3822_v58  ;;  %2430 = vmatmul.mubr.bf16.gmra.mrb[136].mxu0 %v3822_v58 }
 0x255   : > { %2246 = vmatprep.mubr.bf16.mxu1 %v3880_v56  ;;  %2439 = vmatprep.mubr.bf16.mxu0 %v3880_v56 }
 0x257   : > { %v1752_v4 = vpop.f32.mrb[32].mxu1  ;;  %v1945_v55 = vpop.f32.mrb[32].mxu0 }
 0x258   : > { %v1753_v44 = vadd.f32 %v1752_v4, %v4146_v15  ;;  %v1946_v58 = vadd.f32 %v1945_v55, %v4149_v60  ;;  %v1754_v34 = vpop.f32.mrb[33].mxu1  ;;  %v1947_v38 = vpop.f32.mrb[33].mxu0 }
 0x259   : > { %v1755_v45 = vadd.f32 %v1754_v34, %v4156_v63  ;;  %v1948_v52 = vadd.f32 %v1947_v38, %v4159_v1  ;;  %v1756_v56 = vpop.f32.mrb[34].mxu1  ;;  %v1949_v37 = vpop.f32.mrb[34].mxu0 }
 0x25a   : > { %2490 = vst [vmem:[%s4165_s15] sm:$0xff] %v1753_v44  ;;  %2492 = vst [vmem:[%s4165_s15 + $0x10] sm:$0xff] %v1946_v58  ;;  %v1757_v46 = vadd.f32 %v1756_v56, %v4146_v15  ;;  %v1950_v50 = vadd.f32 %v1949_v37, %v4149_v60  ;;  %v1758_v42 = vpop.f32.mrb[35].mxu1  ;;  %v1951_v36 = vpop.f32.mrb[35].mxu0 }
 0x25b   : > { %2491 = vst [vmem:[%s4165_s15 + $0x8] sm:$0xff] %v1755_v45  ;;  %2493 = vst [vmem:[%s4165_s15 + $0x18] sm:$0xff] %v1948_v52  ;;  %v1759_v6 = vadd.f32 %v1758_v42, %v4156_v63  ;;  %v1952_v8 = vadd.f32 %v1951_v36, %v4159_v1 }
 0x25c   : > { %2498 = vst [vmem:[%s4165_s15 + $0x40] sm:$0xff] %v1757_v46  ;;  %2500 = vst [vmem:[%s4165_s15 + $0x50] sm:$0xff] %v1950_v50  ;;  %2247 = vmatmul.mubr.bf16.gmra.mrb[140].mxu1 %v3874_v51  ;;  %2440 = vmatmul.mubr.bf16.gmra.mrb[140].mxu0 %v3874_v51 }
 0x25d   : > { %2499 = vst [vmem:[%s4165_s15 + $0x48] sm:$0xff] %v1759_v6  ;;  %2501 = vst [vmem:[%s4165_s15 + $0x58] sm:$0xff] %v1952_v8  ;;  %2256 = vmatprep.mubr.bf16.mxu1 %v3932_v57  ;;  %2449 = vmatprep.mubr.bf16.mxu0 %v3932_v57 }
 0x25f   : > { %v1762_v24 = vpop.f32.mrb[36].mxu1  ;;  %v1955_v26 = vpop.f32.mrb[36].mxu0 }
 0x260   : > { %v1763_v27 = vadd.f32 %v1762_v24, %v4146_v15  ;;  %v1956_v28 = vadd.f32 %v1955_v26, %v4149_v60  ;;  %v1764_v30 = vpop.f32.mrb[37].mxu1  ;;  %v1957_v31 = vpop.f32.mrb[37].mxu0 }
 0x261   : > { %v1765_v51 = vadd.f32 %v1764_v30, %v4156_v63  ;;  %v1958_v32 = vadd.f32 %v1957_v31, %v4159_v1  ;;  %v1766_v53 = vpop.f32.mrb[38].mxu1  ;;  %v1959_v54 = vpop.f32.mrb[38].mxu0 }
 0x262   : > { %2506 = vst [vmem:[%s4165_s15 + $0x80] sm:$0xff] %v1763_v27  ;;  %2508 = vst [vmem:[%s4165_s15 + $0x90] sm:$0xff] %v1956_v28  ;;  %v1767_v57 = vadd.f32 %v1766_v53, %v4146_v15  ;;  %v1960_v33 = vadd.f32 %v1959_v54, %v4149_v60  ;;  %v1768_v41 = vpop.f32.mrb[39].mxu1  ;;  %v1961_v39 = vpop.f32.mrb[39].mxu0 }
 0x263   : > { %2507 = vst [vmem:[%s4165_s15 + $0x88] sm:$0xff] %v1765_v51  ;;  %2509 = vst [vmem:[%s4165_s15 + $0x98] sm:$0xff] %v1958_v32  ;;  %v1769_v10 = vadd.f32 %v1768_v41, %v4156_v63  ;;  %v1962_v19 = vadd.f32 %v1961_v39, %v4159_v1 }
 0x264   : > { %2514 = vst [vmem:[%s4165_s15 + $0xc0] sm:$0xff] %v1767_v57  ;;  %2516 = vst [vmem:[%s4165_s15 + $0xd0] sm:$0xff] %v1960_v33  ;;  %2257 = vmatmul.mubr.bf16.gmra.mrb[144].mxu1 %v3926_v49  ;;  %2450 = vmatmul.mubr.bf16.gmra.mrb[144].mxu0 %v3926_v49 }
 0x265   : > { %2515 = vst [vmem:[%s4165_s15 + $0xc8] sm:$0xff] %v1769_v10  ;;  %2517 = vst [vmem:[%s4165_s15 + $0xd8] sm:$0xff] %v1962_v19  ;;  %2266 = vmatprep.mubr.bf16.mxu1 %v3984_v62  ;;  %2459 = vmatprep.mubr.bf16.mxu0 %v3984_v62 }
 0x267   : > { %v1772_v21 = vpop.f32.mrb[40].mxu1  ;;  %v1965_v12 = vpop.f32.mrb[40].mxu0 }
 0x268   : > { %v1773_v22 = vadd.f32 %v1772_v21, %v4146_v15  ;;  %v1966_v2 = vadd.f32 %v1965_v12, %v4149_v60  ;;  %v1774_v5 = vpop.f32.mrb[41].mxu1  ;;  %v1967_v7 = vpop.f32.mrb[41].mxu0 }
 0x269   : > { %v1775_v49 = vadd.f32 %v1774_v5, %v4156_v63  ;;  %v1968_v47 = vadd.f32 %v1967_v7, %v4159_v1  ;;  %v1776_v3 = vpop.f32.mrb[42].mxu1  ;;  %v1969_v40 = vpop.f32.mrb[42].mxu0 }
 0x26a   : > { %2522 = vst [vmem:[%s4165_s15 + $0x100] sm:$0xff] %v1773_v22  ;;  %2524 = vst [vmem:[%s4165_s15 + $0x110] sm:$0xff] %v1966_v2  ;;  %v1777_v62 = vadd.f32 %v1776_v3, %v4146_v15  ;;  %v1970_v25 = vadd.f32 %v1969_v40, %v4149_v60  ;;  %v1778_v29 = vpop.f32.mrb[43].mxu1  ;;  %v1971_v17 = vpop.f32.mrb[43].mxu0 }
 0x26b   : > { %2523 = vst [vmem:[%s4165_s15 + $0x108] sm:$0xff] %v1775_v49  ;;  %2525 = vst [vmem:[%s4165_s15 + $0x118] sm:$0xff] %v1968_v47  ;;  %v1779_v20 = vadd.f32 %v1778_v29, %v4156_v63  ;;  %v1972_v61 = vadd.f32 %v1971_v17, %v4159_v1 }
 0x26c   : > { %2530 = vst [vmem:[%s4165_s15 + $0x140] sm:$0xff] %v1777_v62  ;;  %2532 = vst [vmem:[%s4165_s15 + $0x150] sm:$0xff] %v1970_v25  ;;  %2267 = vmatmul.mubr.bf16.gmra.mrb[148].mxu1 %v3978_v35  ;;  %2460 = vmatmul.mubr.bf16.gmra.mrb[148].mxu0 %v3978_v35 }
 0x26d   : > { %2531 = vst [vmem:[%s4165_s15 + $0x148] sm:$0xff] %v1779_v20  ;;  %2533 = vst [vmem:[%s4165_s15 + $0x158] sm:$0xff] %v1972_v61  ;;  %2276 = vmatprep.mubr.bf16.mxu1 %v4030_v9  ;;  %2469 = vmatprep.mubr.bf16.mxu0 %v4030_v9 }
 0x26f   : > { %v1782_v11 = vpop.f32.mrb[44].mxu1  ;;  %v1975_v13 = vpop.f32.mrb[44].mxu0 }
 0x270   : > { %v1783_v23 = vadd.f32 %v1782_v11, %v4146_v15  ;;  %v1976_v14 = vadd.f32 %v1975_v13, %v4149_v60  ;;  %v1784_v16 = vpop.f32.mrb[45].mxu1  ;;  %v1977_v4 = vpop.f32.mrb[45].mxu0 }
 0x271   : > { %v1785_v35 = vadd.f32 %v1784_v16, %v4156_v63  ;;  %v1978_v55 = vadd.f32 %v1977_v4, %v4159_v1  ;;  %v1786_v44 = vpop.f32.mrb[46].mxu1  ;;  %v1979_v58 = vpop.f32.mrb[46].mxu0 }
 0x272   : > { %2538 = vst [vmem:[%s4165_s15 + $0x180] sm:$0xff] %v1783_v23  ;;  %2540 = vst [vmem:[%s4165_s15 + $0x190] sm:$0xff] %v1976_v14  ;;  %v1787_v9 = vadd.f32 %v1786_v44, %v4146_v15  ;;  %v1980_v34 = vadd.f32 %v1979_v58, %v4149_v60  ;;  %v1788_v38 = vpop.f32.mrb[47].mxu1  ;;  %v1981_v45 = vpop.f32.mrb[47].mxu0 }
 0x273   : > { %2539 = vst [vmem:[%s4165_s15 + $0x188] sm:$0xff] %v1785_v35  ;;  %2541 = vst [vmem:[%s4165_s15 + $0x198] sm:$0xff] %v1978_v55  ;;  %v1789_v52 = vadd.f32 %v1788_v38, %v4156_v63  ;;  %v1982_v56 = vadd.f32 %v1981_v45, %v4159_v1 }
 0x274   : > { %2546 = vst [vmem:[%s4165_s15 + $0x1c0] sm:$0xff] %v1787_v9  ;;  %2548 = vst [vmem:[%s4165_s15 + $0x1d0] sm:$0xff] %v1980_v34  ;;  %2277 = vmatmul.mubr.bf16.gmra.mrb[152].mxu1 %v4026_v59  ;;  %2470 = vmatmul.mubr.bf16.gmra.mrb[152].mxu0 %v4026_v59 }
 0x275   : > { %2547 = vst [vmem:[%s4165_s15 + $0x1c8] sm:$0xff] %v1789_v52  ;;  %2549 = vst [vmem:[%s4165_s15 + $0x1d8] sm:$0xff] %v1982_v56  ;;  %2286 = vmatprep.mubr.bf16.mxu1 %v4054_v48  ;;  %2479 = vmatprep.mubr.bf16.mxu0 %v4054_v48 }
 0x277   : > { %v1792_v37 = vpop.f32.mrb[48].mxu1  ;;  %v1985_v46 = vpop.f32.mrb[48].mxu0 }
 0x278   : > { %v1793_v50 = vadd.f32 %v1792_v37, %v4146_v15  ;;  %v1986_v42 = vadd.f32 %v1985_v46, %v4149_v60  ;;  %v1794_v36 = vpop.f32.mrb[49].mxu1  ;;  %v1987_v6 = vpop.f32.mrb[49].mxu0 }
 0x279   : > { %v1795_v59 = vadd.f32 %v1794_v36, %v4156_v63  ;;  %v1988_v8 = vadd.f32 %v1987_v6, %v4159_v1  ;;  %v1796_v24 = vpop.f32.mrb[50].mxu1  ;;  %v1989_v26 = vpop.f32.mrb[50].mxu0 }
 0x27a   : > { %2554 = vst [vmem:[%s4165_s15 + $0x200] sm:$0xff] %v1793_v50  ;;  %2556 = vst [vmem:[%s4165_s15 + $0x210] sm:$0xff] %v1986_v42  ;;  %v1797_v48 = vadd.f32 %v1796_v24, %v4146_v15  ;;  %v1990_v27 = vadd.f32 %v1989_v26, %v4149_v60  ;;  %v1798_v28 = vpop.f32.mrb[51].mxu1  ;;  %v1991_v30 = vpop.f32.mrb[51].mxu0 }
 0x27b   : > { %2555 = vst [vmem:[%s4165_s15 + $0x208] sm:$0xff] %v1795_v59  ;;  %2557 = vst [vmem:[%s4165_s15 + $0x218] sm:$0xff] %v1988_v8  ;;  %v1799_v31 = vadd.f32 %v1798_v28, %v4156_v63  ;;  %v1992_v51 = vadd.f32 %v1991_v30, %v4159_v1 }
 0x27c   : > { %2562 = vst [vmem:[%s4165_s15 + $0x240] sm:$0xff] %v1797_v48  ;;  %2564 = vst [vmem:[%s4165_s15 + $0x250] sm:$0xff] %v1990_v27  ;;  %2287 = vmatmul.mubr.bf16.gmra.mrb[156].mxu1 %v4050_v0  ;;  %2480 = vmatmul.mubr.bf16.gmra.mrb[156].mxu0 %v4050_v0 }
 0x27d   : > { %2563 = vst [vmem:[%s4165_s15 + $0x248] sm:$0xff] %v1799_v31  ;;  %2565 = vst [vmem:[%s4165_s15 + $0x258] sm:$0xff] %v1992_v51 }
 0x27f   : > { %v1802_v32 = vpop.f32.mrb[52].mxu1  ;;  %v1995_v53 = vpop.f32.mrb[52].mxu0 }
 0x280   : > { %v1803_v54 = vadd.f32 %v1802_v32, %v4146_v15  ;;  %v1996_v57 = vadd.f32 %v1995_v53, %v4149_v60  ;;  %v1804_v33 = vpop.f32.mrb[53].mxu1  ;;  %v1997_v41 = vpop.f32.mrb[53].mxu0 }
 0x281   : > { %v1805_v39 = vadd.f32 %v1804_v33, %v4156_v63  ;;  %v1998_v10 = vadd.f32 %v1997_v41, %v4159_v1  ;;  %v1806_v0 = vpop.f32.mrb[54].mxu1  ;;  %v1999_v19 = vpop.f32.mrb[54].mxu0 }
 0x282   : > { %2570 = vst [vmem:[%s4165_s15 + $0x280] sm:$0xff] %v1803_v54  ;;  %2572 = vst [vmem:[%s4165_s15 + $0x290] sm:$0xff] %v1996_v57  ;;  %v1807_v21 = vadd.f32 %v1806_v0, %v4146_v15  ;;  %v2000_v12 = vadd.f32 %v1999_v19, %v4149_v60  ;;  %v1808_v22 = vpop.f32.mrb[55].mxu1  ;;  %v2001_v2 = vpop.f32.mrb[55].mxu0 }
 0x283   : > { %2571 = vst [vmem:[%s4165_s15 + $0x288] sm:$0xff] %v1805_v39  ;;  %2573 = vst [vmem:[%s4165_s15 + $0x298] sm:$0xff] %v1998_v10  ;;  %v1809_v5 = vadd.f32 %v1808_v22, %v4156_v63  ;;  %v2002_v7 = vadd.f32 %v2001_v2, %v4159_v1 }
 0x284   : > { %2578 = vst [vmem:[%s4165_s15 + $0x2c0] sm:$0xff] %v1807_v21  ;;  %2580 = vst [vmem:[%s4165_s15 + $0x2d0] sm:$0xff] %v2000_v12 }
 0x285   : > { %2579 = vst [vmem:[%s4165_s15 + $0x2c8] sm:$0xff] %v1809_v5  ;;  %2581 = vst [vmem:[%s4165_s15 + $0x2d8] sm:$0xff] %v2002_v7 }
 0x287   : > { %v1812_v49 = vpop.f32.mrb[56].mxu1  ;;  %v2005_v47 = vpop.f32.mrb[56].mxu0 }
 0x288   : > { %v1813_v3 = vadd.f32 %v1812_v49, %v4146_v15  ;;  %v2006_v40 = vadd.f32 %v2005_v47, %v4149_v60  ;;  %v1814_v62 = vpop.f32.mrb[57].mxu1  ;;  %v2007_v25 = vpop.f32.mrb[57].mxu0 }
 0x289   : > { %v1815_v29 = vadd.f32 %v1814_v62, %v4156_v63  ;;  %v2008_v17 = vadd.f32 %v2007_v25, %v4159_v1  ;;  %v1816_v20 = vpop.f32.mrb[58].mxu1  ;;  %v2009_v61 = vpop.f32.mrb[58].mxu0 }
 0x28a   : > { %2586 = vst [vmem:[%s4165_s15 + $0x300] sm:$0xff] %v1813_v3  ;;  %2588 = vst [vmem:[%s4165_s15 + $0x310] sm:$0xff] %v2006_v40  ;;  %v1817_v11 = vadd.f32 %v1816_v20, %v4146_v15  ;;  %v2010_v13 = vadd.f32 %v2009_v61, %v4149_v60  ;;  %v1818_v23 = vpop.f32.mrb[59].mxu1  ;;  %v2011_v14 = vpop.f32.mrb[59].mxu0 }
 0x28b   : > { %2587 = vst [vmem:[%s4165_s15 + $0x308] sm:$0xff] %v1815_v29  ;;  %2589 = vst [vmem:[%s4165_s15 + $0x318] sm:$0xff] %v2008_v17  ;;  %v1819_v16 = vadd.f32 %v1818_v23, %v4156_v63  ;;  %v2012_v4 = vadd.f32 %v2011_v14, %v4159_v1 }
 0x28c   : > { %2594 = vst [vmem:[%s4165_s15 + $0x340] sm:$0xff] %v1817_v11  ;;  %2596 = vst [vmem:[%s4165_s15 + $0x350] sm:$0xff] %v2010_v13 }
 0x28d   : > { %2595 = vst [vmem:[%s4165_s15 + $0x348] sm:$0xff] %v1819_v16  ;;  %2597 = vst [vmem:[%s4165_s15 + $0x358] sm:$0xff] %v2012_v4 }
 0x28f   : > { %v1822_v35 = vpop.f32.mrb[60].mxu1  ;;  %v2015_v55 = vpop.f32.mrb[60].mxu0 }
 0x290   : > { %v1823_v44 = vadd.f32 %v1822_v35, %v4146_v15  ;;  %v2016_v58 = vadd.f32 %v2015_v55, %v4149_v60  ;;  %v1824_v9 = vpop.f32.mrb[61].mxu1  ;;  %v2017_v34 = vpop.f32.mrb[61].mxu0 }
 0x291   : > { %v1825_v38 = vadd.f32 %v1824_v9, %v4156_v63  ;;  %v2018_v45 = vadd.f32 %v2017_v34, %v4159_v1  ;;  %v1826_v52 = vpop.f32.mrb[62].mxu1  ;;  %v2019_v56 = vpop.f32.mrb[62].mxu0 }
 0x292   : > { %2602 = vst [vmem:[%s4165_s15 + $0x380] sm:$0xff] %v1823_v44  ;;  %2604 = vst [vmem:[%s4165_s15 + $0x390] sm:$0xff] %v2016_v58  ;;  %v1827_v37 = vadd.f32 %v1826_v52, %v4146_v15  ;;  %v2020_v46 = vadd.f32 %v2019_v56, %v4149_v60  ;;  %v1828_v50 = vpop.f32.mrb[63].mxu1  ;;  %v2021_v42 = vpop.f32.mrb[63].mxu0 }
 0x293   : > { %2603 = vst [vmem:[%s4165_s15 + $0x388] sm:$0xff] %v1825_v38  ;;  %2605 = vst [vmem:[%s4165_s15 + $0x398] sm:$0xff] %v2018_v45  ;;  %v1829_v36 = vadd.f32 %v1828_v50, %v4156_v63  ;;  %v2022_v6 = vadd.f32 %v2021_v42, %v4159_v1 }
 0x294   : > { %2610 = vst [vmem:[%s4165_s15 + $0x3c0] sm:$0xff] %v1827_v37  ;;  %2612 = vst [vmem:[%s4165_s15 + $0x3d0] sm:$0xff] %v2020_v46 }
 0x295   : > { %2611 = vst [vmem:[%s4165_s15 + $0x3c8] sm:$0xff] %v1829_v36  ;;  %2613 = vst [vmem:[%s4165_s15 + $0x3d8] sm:$0xff] %v2022_v6 }
 0x297   : > { %v1832_v59 = vpop.f32.mrb[64].mxu1  ;;  %v2025_v8 = vpop.f32.mrb[64].mxu0 }
 0x298   : > { %v1833_v24 = vadd.f32 %v1832_v59, %v4146_v15  ;;  %v2026_v26 = vadd.f32 %v2025_v8, %v4149_v60  ;;  %v1834_v48 = vpop.f32.mrb[65].mxu1  ;;  %v2027_v27 = vpop.f32.mrb[65].mxu0 }
 0x299   : > { %v1835_v28 = vadd.f32 %v1834_v48, %v4156_v63  ;;  %v2028_v30 = vadd.f32 %v2027_v27, %v4159_v1  ;;  %v1836_v31 = vpop.f32.mrb[66].mxu1  ;;  %v2029_v51 = vpop.f32.mrb[66].mxu0 }
 0x29a   : > { %2618 = vst [vmem:[%s4165_s15 + $0x400] sm:$0xff] %v1833_v24  ;;  %2620 = vst [vmem:[%s4165_s15 + $0x410] sm:$0xff] %v2026_v26  ;;  %v1837_v32 = vadd.f32 %v1836_v31, %v4146_v15  ;;  %v2030_v53 = vadd.f32 %v2029_v51, %v4149_v60  ;;  %v1838_v54 = vpop.f32.mrb[67].mxu1  ;;  %v2031_v57 = vpop.f32.mrb[67].mxu0 }
 0x29b   : > { %2619 = vst [vmem:[%s4165_s15 + $0x408] sm:$0xff] %v1835_v28  ;;  %2621 = vst [vmem:[%s4165_s15 + $0x418] sm:$0xff] %v2028_v30  ;;  %v1839_v33 = vadd.f32 %v1838_v54, %v4156_v63  ;;  %v2032_v41 = vadd.f32 %v2031_v57, %v4159_v1 }
 0x29c   : > { %2626 = vst [vmem:[%s4165_s15 + $0x440] sm:$0xff] %v1837_v32  ;;  %2628 = vst [vmem:[%s4165_s15 + $0x450] sm:$0xff] %v2030_v53 }
 0x29d   : > { %2627 = vst [vmem:[%s4165_s15 + $0x448] sm:$0xff] %v1839_v33  ;;  %2629 = vst [vmem:[%s4165_s15 + $0x458] sm:$0xff] %v2032_v41 }
 0x29f   : > { %v1842_v39 = vpop.f32.mrb[68].mxu1  ;;  %v2035_v10 = vpop.f32.mrb[68].mxu0 }
 0x2a0   : > { %v1843_v0 = vadd.f32 %v1842_v39, %v4146_v15  ;;  %v2036_v19 = vadd.f32 %v2035_v10, %v4149_v60  ;;  %v1844_v21 = vpop.f32.mrb[69].mxu1  ;;  %v2037_v12 = vpop.f32.mrb[69].mxu0 }
 0x2a1   : > { %v1845_v22 = vadd.f32 %v1844_v21, %v4156_v63  ;;  %v2038_v2 = vadd.f32 %v2037_v12, %v4159_v1  ;;  %v1846_v5 = vpop.f32.mrb[70].mxu1  ;;  %v2039_v7 = vpop.f32.mrb[70].mxu0 }
 0x2a2   : > { %2634 = vst [vmem:[%s4165_s15 + $0x480] sm:$0xff] %v1843_v0  ;;  %2636 = vst [vmem:[%s4165_s15 + $0x490] sm:$0xff] %v2036_v19  ;;  %v1847_v49 = vadd.f32 %v1846_v5, %v4146_v15  ;;  %v2040_v47 = vadd.f32 %v2039_v7, %v4149_v60  ;;  %v1848_v3 = vpop.f32.mrb[71].mxu1  ;;  %v2041_v40 = vpop.f32.mrb[71].mxu0 }
 0x2a3   : > { %2635 = vst [vmem:[%s4165_s15 + $0x488] sm:$0xff] %v1845_v22  ;;  %2637 = vst [vmem:[%s4165_s15 + $0x498] sm:$0xff] %v2038_v2  ;;  %v1849_v62 = vadd.f32 %v1848_v3, %v4156_v63  ;;  %v2042_v25 = vadd.f32 %v2041_v40, %v4159_v1 }
 0x2a4   : > { %2642 = vst [vmem:[%s4165_s15 + $0x4c0] sm:$0xff] %v1847_v49  ;;  %2644 = vst [vmem:[%s4165_s15 + $0x4d0] sm:$0xff] %v2040_v47 }
 0x2a5   : > { %2643 = vst [vmem:[%s4165_s15 + $0x4c8] sm:$0xff] %v1849_v62  ;;  %2645 = vst [vmem:[%s4165_s15 + $0x4d8] sm:$0xff] %v2042_v25 }
 0x2a7   : > { %v1852_v29 = vpop.f32.mrb[72].mxu1  ;;  %v2045_v17 = vpop.f32.mrb[72].mxu0 }
 0x2a8   : > { %v1853_v20 = vadd.f32 %v1852_v29, %v4146_v15  ;;  %v2046_v61 = vadd.f32 %v2045_v17, %v4149_v60  ;;  %v1854_v11 = vpop.f32.mrb[73].mxu1  ;;  %v2047_v13 = vpop.f32.mrb[73].mxu0 }
 0x2a9   : > { %v1855_v23 = vadd.f32 %v1854_v11, %v4156_v63  ;;  %v2048_v14 = vadd.f32 %v2047_v13, %v4159_v1  ;;  %v1856_v16 = vpop.f32.mrb[74].mxu1  ;;  %v2049_v4 = vpop.f32.mrb[74].mxu0 }
 0x2aa   : > { %2650 = vst [vmem:[%s4165_s15 + $0x500] sm:$0xff] %v1853_v20  ;;  %2652 = vst [vmem:[%s4165_s15 + $0x510] sm:$0xff] %v2046_v61  ;;  %v1857_v35 = vadd.f32 %v1856_v16, %v4146_v15  ;;  %v2050_v55 = vadd.f32 %v2049_v4, %v4149_v60  ;;  %v1858_v44 = vpop.f32.mrb[75].mxu1  ;;  %v2051_v58 = vpop.f32.mrb[75].mxu0 }
 0x2ab   : > { %2651 = vst [vmem:[%s4165_s15 + $0x508] sm:$0xff] %v1855_v23  ;;  %2653 = vst [vmem:[%s4165_s15 + $0x518] sm:$0xff] %v2048_v14  ;;  %v1859_v9 = vadd.f32 %v1858_v44, %v4156_v63  ;;  %v2052_v34 = vadd.f32 %v2051_v58, %v4159_v1 }
 0x2ac   : > { %2658 = vst [vmem:[%s4165_s15 + $0x540] sm:$0xff] %v1857_v35  ;;  %2660 = vst [vmem:[%s4165_s15 + $0x550] sm:$0xff] %v2050_v55 }
 0x2ad   : > { %2659 = vst [vmem:[%s4165_s15 + $0x548] sm:$0xff] %v1859_v9  ;;  %2661 = vst [vmem:[%s4165_s15 + $0x558] sm:$0xff] %v2052_v34 }
 0x2af   : > { %v1862_v38 = vpop.f32.mrb[76].mxu1  ;;  %v2055_v45 = vpop.f32.mrb[76].mxu0 }
 0x2b0   : > { %v1863_v52 = vadd.f32 %v1862_v38, %v4146_v15  ;;  %v2056_v56 = vadd.f32 %v2055_v45, %v4149_v60  ;;  %v1864_v37 = vpop.f32.mrb[77].mxu1  ;;  %v2057_v46 = vpop.f32.mrb[77].mxu0 }
 0x2b1   : > { %v1865_v50 = vadd.f32 %v1864_v37, %v4156_v63  ;;  %v2058_v42 = vadd.f32 %v2057_v46, %v4159_v1  ;;  %v1866_v36 = vpop.f32.mrb[78].mxu1  ;;  %v2059_v6 = vpop.f32.mrb[78].mxu0 }
 0x2b2   : > { %2666 = vst [vmem:[%s4165_s15 + $0x580] sm:$0xff] %v1863_v52  ;;  %2668 = vst [vmem:[%s4165_s15 + $0x590] sm:$0xff] %v2056_v56  ;;  %v1867_v59 = vadd.f32 %v1866_v36, %v4146_v15  ;;  %v2060_v8 = vadd.f32 %v2059_v6, %v4149_v60  ;;  %v1868_v24 = vpop.f32.mrb[79].mxu1  ;;  %v2061_v26 = vpop.f32.mrb[79].mxu0  ;;  %v1056_v36 = vsub.s32 4, %v3694_v43  ;;  %v1064_v6 = vsub.s32 6, %v3694_v43 }
 0x2b3   : > { %2667 = vst [vmem:[%s4165_s15 + $0x588] sm:$0xff] %v1865_v50  ;;  %2669 = vst [vmem:[%s4165_s15 + $0x598] sm:$0xff] %v2058_v42  ;;  %v1869_v48 = vadd.f32 %v1868_v24, %v4156_v63  ;;  %v2062_v27 = vadd.f32 %v2061_v26, %v4159_v1 }
 0x2b4   : > { %2674 = vst [vmem:[%s4165_s15 + $0x5c0] sm:$0xff] %v1867_v59  ;;  %2676 = vst [vmem:[%s4165_s15 + $0x5d0] sm:$0xff] %v2060_v8 }
 0x2b5   : > { %2675 = vst [vmem:[%s4165_s15 + $0x5c8] sm:$0xff] %v1869_v48  ;;  %2677 = vst [vmem:[%s4165_s15 + $0x5d8] sm:$0xff] %v2062_v27  ;;  %v1060_v48 = vsub.s32 5, %v3694_v43  ;;  %v1068_v27 = vsub.s32 7, %v3694_v43 }
 0x2b7   : > { %v1872_v28 = vpop.f32.mrb[80].mxu1  ;;  %v2065_v30 = vpop.f32.mrb[80].mxu0 }
 0x2b8   : > { %v1873_v31 = vadd.f32 %v1872_v28, %v4146_v15  ;;  %v2066_v51 = vadd.f32 %v2065_v30, %v4149_v60  ;;  %v1874_v32 = vpop.f32.mrb[81].mxu1  ;;  %v2067_v53 = vpop.f32.mrb[81].mxu0 }
 0x2b9   : > { %v1875_v54 = vadd.f32 %v1874_v32, %v4156_v63  ;;  %v2068_v57 = vadd.f32 %v2067_v53, %v4159_v1  ;;  %v1876_v33 = vpop.f32.mrb[82].mxu1  ;;  %v2069_v41 = vpop.f32.mrb[82].mxu0 }
 0x2ba   : > { %2682 = vst [vmem:[%s4165_s15 + $0x600] sm:$0xff] %v1873_v31  ;;  %2684 = vst [vmem:[%s4165_s15 + $0x610] sm:$0xff] %v2066_v51  ;;  %v1877_v39 = vadd.f32 %v1876_v33, %v4146_v15  ;;  %v2070_v10 = vadd.f32 %v2069_v41, %v4149_v60  ;;  %v1878_v0 = vpop.f32.mrb[83].mxu1  ;;  %v2071_v19 = vpop.f32.mrb[83].mxu0  ;;  %v4440_v41 = vrot.slane %v4137_v18, %v1056_v36 }
 0x2bb   : > { %2683 = vst [vmem:[%s4165_s15 + $0x608] sm:$0xff] %v1875_v54  ;;  %2685 = vst [vmem:[%s4165_s15 + $0x618] sm:$0xff] %v2068_v57  ;;  %v1879_v21 = vadd.f32 %v1878_v0, %v4156_v63  ;;  %v2072_v12 = vadd.f32 %v2071_v19, %v4159_v1 }
 0x2bc   : > { %2690 = vst [vmem:[%s4165_s15 + $0x640] sm:$0xff] %v1877_v39  ;;  %2692 = vst [vmem:[%s4165_s15 + $0x650] sm:$0xff] %v2070_v10  ;;  %v4443_v39 = vrot.slane %v4137_v18, %v1064_v6 }
 0x2bd   : > { %2691 = vst [vmem:[%s4165_s15 + $0x648] sm:$0xff] %v1879_v21  ;;  %2693 = vst [vmem:[%s4165_s15 + $0x658] sm:$0xff] %v2072_v12 }
 0x2bf   : > { %v1882_v22 = vpop.f32.mrb[84].mxu1  ;;  %v2075_v2 = vpop.f32.mrb[84].mxu0 }
 0x2c0   : > { %v1883_v5 = vadd.f32 %v1882_v22, %v4146_v15  ;;  %v2076_v7 = vadd.f32 %v2075_v2, %v4149_v60  ;;  %v1884_v49 = vpop.f32.mrb[85].mxu1  ;;  %v2077_v47 = vpop.f32.mrb[85].mxu0 }
 0x2c1   : > { %v1885_v3 = vadd.f32 %v1884_v49, %v4156_v63  ;;  %v2078_v40 = vadd.f32 %v2077_v47, %v4159_v1  ;;  %v1886_v62 = vpop.f32.mrb[86].mxu1  ;;  %v2079_v25 = vpop.f32.mrb[86].mxu0 }
 0x2c2   : > { %2698 = vst [vmem:[%s4165_s15 + $0x680] sm:$0xff] %v1883_v5  ;;  %2700 = vst [vmem:[%s4165_s15 + $0x690] sm:$0xff] %v2076_v7  ;;  %v1887_v29 = vadd.f32 %v1886_v62, %v4146_v15  ;;  %v2080_v17 = vadd.f32 %v2079_v25, %v4149_v60  ;;  %v1888_v20 = vpop.f32.mrb[87].mxu1  ;;  %v2081_v61 = vpop.f32.mrb[87].mxu0 }
 0x2c3   : > { %2699 = vst [vmem:[%s4165_s15 + $0x688] sm:$0xff] %v1885_v3  ;;  %2701 = vst [vmem:[%s4165_s15 + $0x698] sm:$0xff] %v2078_v40  ;;  %v1889_v11 = vadd.f32 %v1888_v20, %v4156_v63  ;;  %v2082_v13 = vadd.f32 %v2081_v61, %v4159_v1 }
 0x2c4   : > { %2706 = vst [vmem:[%s4165_s15 + $0x6c0] sm:$0xff] %v1887_v29  ;;  %2708 = vst [vmem:[%s4165_s15 + $0x6d0] sm:$0xff] %v2080_v17 }
 0x2c5   : > { %2707 = vst [vmem:[%s4165_s15 + $0x6c8] sm:$0xff] %v1889_v11  ;;  %2709 = vst [vmem:[%s4165_s15 + $0x6d8] sm:$0xff] %v2082_v13 }
 0x2c7   : > { %v1892_v23 = vpop.f32.mrb[88].mxu1  ;;  %v2085_v14 = vpop.f32.mrb[88].mxu0 }
 0x2c8   : > { %v1893_v16 = vadd.f32 %v1892_v23, %v4146_v15  ;;  %v2086_v4 = vadd.f32 %v2085_v14, %v4149_v60  ;;  %v1894_v35 = vpop.f32.mrb[89].mxu1  ;;  %v2087_v55 = vpop.f32.mrb[89].mxu0 }
 0x2c9   : > { %v1895_v44 = vadd.f32 %v1894_v35, %v4156_v63  ;;  %v2088_v58 = vadd.f32 %v2087_v55, %v4159_v1  ;;  %v1896_v9 = vpop.f32.mrb[90].mxu1  ;;  %v2089_v34 = vpop.f32.mrb[90].mxu0 }
 0x2ca   : > { %2714 = vst [vmem:[%s4165_s15 + $0x700] sm:$0xff] %v1893_v16  ;;  %2716 = vst [vmem:[%s4165_s15 + $0x710] sm:$0xff] %v2086_v4  ;;  %v1897_v38 = vadd.f32 %v1896_v9, %v4146_v15  ;;  %v2090_v45 = vadd.f32 %v2089_v34, %v4149_v60  ;;  %v1898_v52 = vpop.f32.mrb[91].mxu1  ;;  %v2091_v56 = vpop.f32.mrb[91].mxu0 }
 0x2cb   : > { %2715 = vst [vmem:[%s4165_s15 + $0x708] sm:$0xff] %v1895_v44  ;;  %2717 = vst [vmem:[%s4165_s15 + $0x718] sm:$0xff] %v2088_v58  ;;  %v1899_v37 = vadd.f32 %v1898_v52, %v4156_v63  ;;  %v2092_v46 = vadd.f32 %v2091_v56, %v4159_v1 }
 0x2cc   : > { %2722 = vst [vmem:[%s4165_s15 + $0x740] sm:$0xff] %v1897_v38  ;;  %2724 = vst [vmem:[%s4165_s15 + $0x750] sm:$0xff] %v2090_v45 }
 0x2cd   : > { %2723 = vst [vmem:[%s4165_s15 + $0x748] sm:$0xff] %v1899_v37  ;;  %2725 = vst [vmem:[%s4165_s15 + $0x758] sm:$0xff] %v2092_v46 }
 0x2cf   : > { %v1902_v50 = vpop.f32.mrb[92].mxu1  ;;  %v2095_v42 = vpop.f32.mrb[92].mxu0 }
 0x2d0   : > { %v1903_v59 = vadd.f32 %v1902_v50, %v4146_v15  ;;  %v2096_v8 = vadd.f32 %v2095_v42, %v4149_v60  ;;  %v1904_v24 = vpop.f32.mrb[93].mxu1  ;;  %v2097_v26 = vpop.f32.mrb[93].mxu0 }
 0x2d1   : > { %v1905_v28 = vadd.f32 %v1904_v24, %v4156_v63  ;;  %v2098_v30 = vadd.f32 %v2097_v26, %v4159_v1  ;;  %v1906_v31 = vpop.f32.mrb[94].mxu1  ;;  %v2099_v51 = vpop.f32.mrb[94].mxu0 }
 0x2d2   : > { %2730 = vst [vmem:[%s4165_s15 + $0x780] sm:$0xff] %v1903_v59  ;;  %2732 = vst [vmem:[%s4165_s15 + $0x790] sm:$0xff] %v2096_v8  ;;  %v1907_v32 = vadd.f32 %v1906_v31, %v4146_v15  ;;  %v2100_v53 = vadd.f32 %v2099_v51, %v4149_v60  ;;  %v1908_v54 = vpop.f32.mrb[95].mxu1  ;;  %v2101_v57 = vpop.f32.mrb[95].mxu0  ;;  %v4448_v15 = vrot.slane %v4137_v18, %v1060_v48 }
 0x2d3   : > { %2731 = vst [vmem:[%s4165_s15 + $0x788] sm:$0xff] %v1905_v28  ;;  %2733 = vst [vmem:[%s4165_s15 + $0x798] sm:$0xff] %v2098_v30  ;;  %v1909_v43 = vadd.f32 %v1908_v54, %v4156_v63  ;;  %v2102_v33 = vadd.f32 %v2101_v57, %v4159_v1  ;;  %v4451_v60 = vrot.slane %v4137_v18, %v1068_v27 }
 0x2d4   : > { %2738 = vst [vmem:[%s4165_s15 + $0x7c0] sm:$0xff] %v1907_v32  ;;  %2740 = vst [vmem:[%s4165_s15 + $0x7d0] sm:$0xff] %v2100_v53 }
 0x2d5   : > { %2739 = vst [vmem:[%s4165_s15 + $0x7c8] sm:$0xff] %v1909_v43  ;;  %2741 = vst [vmem:[%s4165_s15 + $0x7d8] sm:$0xff] %v2102_v33 }
 0x2d7   : > { %v2138_v63 = vpop.f32.mrb[96].mxu1  ;;  %v2331_v1 = vpop.f32.mrb[96].mxu0 }
 0x2d8   : > { %v2139_v10 = vadd.f32 %v2138_v63, %v4440_v41  ;;  %v2332_v0 = vadd.f32 %v2331_v1, %v4443_v39  ;;  %v2140_v19 = vpop.f32.mrb[97].mxu1  ;;  %v2333_v21 = vpop.f32.mrb[97].mxu0 }
 0x2d9   : > { %v2141_v12 = vadd.f32 %v2140_v19, %v4448_v15  ;;  %v2334_v22 = vadd.f32 %v2333_v21, %v4451_v60  ;;  %v2142_v18 = vpop.f32.mrb[98].mxu1  ;;  %v2335_v2 = vpop.f32.mrb[98].mxu0 }
 0x2da   : > { %2494 = vst [vmem:[%s4165_s15 + $0x20] sm:$0xff] %v2139_v10  ;;  %2496 = vst [vmem:[%s4165_s15 + $0x30] sm:$0xff] %v2332_v0  ;;  %v2143_v5 = vadd.f32 %v2142_v18, %v4440_v41  ;;  %v2336_v7 = vadd.f32 %v2335_v2, %v4443_v39  ;;  %v2144_v49 = vpop.f32.mrb[99].mxu1  ;;  %v2337_v47 = vpop.f32.mrb[99].mxu0 }
 0x2db   : > { %2495 = vst [vmem:[%s4165_s15 + $0x28] sm:$0xff] %v2141_v12  ;;  %2497 = vst [vmem:[%s4165_s15 + $0x38] sm:$0xff] %v2334_v22  ;;  %v2145_v3 = vadd.f32 %v2144_v49, %v4448_v15  ;;  %v2338_v40 = vadd.f32 %v2337_v47, %v4451_v60 }
 0x2dc   : > { %2502 = vst [vmem:[%s4165_s15 + $0x60] sm:$0xff] %v2143_v5  ;;  %2504 = vst [vmem:[%s4165_s15 + $0x70] sm:$0xff] %v2336_v7 }
 0x2dd   : > { %2503 = vst [vmem:[%s4165_s15 + $0x68] sm:$0xff] %v2145_v3  ;;  %2505 = vst [vmem:[%s4165_s15 + $0x78] sm:$0xff] %v2338_v40 }
 0x2df   : > { %v2148_v62 = vpop.f32.mrb[100].mxu1  ;;  %v2341_v25 = vpop.f32.mrb[100].mxu0 }
 0x2e0   : > { %v2149_v29 = vadd.f32 %v2148_v62, %v4440_v41  ;;  %v2342_v17 = vadd.f32 %v2341_v25, %v4443_v39  ;;  %v2150_v20 = vpop.f32.mrb[101].mxu1  ;;  %v2343_v61 = vpop.f32.mrb[101].mxu0 }
 0x2e1   : > { %v2151_v11 = vadd.f32 %v2150_v20, %v4448_v15  ;;  %v2344_v13 = vadd.f32 %v2343_v61, %v4451_v60  ;;  %v2152_v23 = vpop.f32.mrb[102].mxu1  ;;  %v2345_v14 = vpop.f32.mrb[102].mxu0 }
 0x2e2   : > { %2510 = vst [vmem:[%s4165_s15 + $0xa0] sm:$0xff] %v2149_v29  ;;  %2512 = vst [vmem:[%s4165_s15 + $0xb0] sm:$0xff] %v2342_v17  ;;  %v2153_v16 = vadd.f32 %v2152_v23, %v4440_v41  ;;  %v2346_v4 = vadd.f32 %v2345_v14, %v4443_v39  ;;  %v2154_v35 = vpop.f32.mrb[103].mxu1  ;;  %v2347_v55 = vpop.f32.mrb[103].mxu0 }
 0x2e3   : > { %2511 = vst [vmem:[%s4165_s15 + $0xa8] sm:$0xff] %v2151_v11  ;;  %2513 = vst [vmem:[%s4165_s15 + $0xb8] sm:$0xff] %v2344_v13  ;;  %v2155_v44 = vadd.f32 %v2154_v35, %v4448_v15  ;;  %v2348_v58 = vadd.f32 %v2347_v55, %v4451_v60 }
 0x2e4   : > { %2518 = vst [vmem:[%s4165_s15 + $0xe0] sm:$0xff] %v2153_v16  ;;  %2520 = vst [vmem:[%s4165_s15 + $0xf0] sm:$0xff] %v2346_v4 }
 0x2e5   : > { %2519 = vst [vmem:[%s4165_s15 + $0xe8] sm:$0xff] %v2155_v44  ;;  %2521 = vst [vmem:[%s4165_s15 + $0xf8] sm:$0xff] %v2348_v58 }
 0x2e7   : > { %v2158_v9 = vpop.f32.mrb[104].mxu1  ;;  %v2351_v34 = vpop.f32.mrb[104].mxu0 }
 0x2e8   : > { %v2159_v38 = vadd.f32 %v2158_v9, %v4440_v41  ;;  %v2352_v45 = vadd.f32 %v2351_v34, %v4443_v39  ;;  %v2160_v52 = vpop.f32.mrb[105].mxu1  ;;  %v2353_v56 = vpop.f32.mrb[105].mxu0 }
 0x2e9   : > { %v2161_v37 = vadd.f32 %v2160_v52, %v4448_v15  ;;  %v2354_v46 = vadd.f32 %v2353_v56, %v4451_v60  ;;  %v2162_v50 = vpop.f32.mrb[106].mxu1  ;;  %v2355_v42 = vpop.f32.mrb[106].mxu0 }
 0x2ea   : > { %2526 = vst [vmem:[%s4165_s15 + $0x120] sm:$0xff] %v2159_v38  ;;  %2528 = vst [vmem:[%s4165_s15 + $0x130] sm:$0xff] %v2352_v45  ;;  %v2163_v36 = vadd.f32 %v2162_v50, %v4440_v41  ;;  %v2356_v6 = vadd.f32 %v2355_v42, %v4443_v39  ;;  %v2164_v59 = vpop.f32.mrb[107].mxu1  ;;  %v2357_v8 = vpop.f32.mrb[107].mxu0 }
 0x2eb   : > { %2527 = vst [vmem:[%s4165_s15 + $0x128] sm:$0xff] %v2161_v37  ;;  %2529 = vst [vmem:[%s4165_s15 + $0x138] sm:$0xff] %v2354_v46  ;;  %v2165_v24 = vadd.f32 %v2164_v59, %v4448_v15  ;;  %v2358_v26 = vadd.f32 %v2357_v8, %v4451_v60 }
 0x2ec   : > { %2534 = vst [vmem:[%s4165_s15 + $0x160] sm:$0xff] %v2163_v36  ;;  %2536 = vst [vmem:[%s4165_s15 + $0x170] sm:$0xff] %v2356_v6 }
 0x2ed   : > { %2535 = vst [vmem:[%s4165_s15 + $0x168] sm:$0xff] %v2165_v24  ;;  %2537 = vst [vmem:[%s4165_s15 + $0x178] sm:$0xff] %v2358_v26 }
 0x2ef   : > { %v2168_v48 = vpop.f32.mrb[108].mxu1  ;;  %v2361_v27 = vpop.f32.mrb[108].mxu0 }
 0x2f0   : > { %v2169_v28 = vadd.f32 %v2168_v48, %v4440_v41  ;;  %v2362_v30 = vadd.f32 %v2361_v27, %v4443_v39  ;;  %v2170_v31 = vpop.f32.mrb[109].mxu1  ;;  %v2363_v51 = vpop.f32.mrb[109].mxu0 }
 0x2f1   : > { %v2171_v32 = vadd.f32 %v2170_v31, %v4448_v15  ;;  %v2364_v53 = vadd.f32 %v2363_v51, %v4451_v60  ;;  %v2172_v54 = vpop.f32.mrb[110].mxu1  ;;  %v2365_v57 = vpop.f32.mrb[110].mxu0 }
 0x2f2   : > { %2542 = vst [vmem:[%s4165_s15 + $0x1a0] sm:$0xff] %v2169_v28  ;;  %2544 = vst [vmem:[%s4165_s15 + $0x1b0] sm:$0xff] %v2362_v30  ;;  %v2173_v43 = vadd.f32 %v2172_v54, %v4440_v41  ;;  %v2366_v33 = vadd.f32 %v2365_v57, %v4443_v39  ;;  %v2174_v63 = vpop.f32.mrb[111].mxu1  ;;  %v2367_v1 = vpop.f32.mrb[111].mxu0 }
 0x2f3   : > { %2543 = vst [vmem:[%s4165_s15 + $0x1a8] sm:$0xff] %v2171_v32  ;;  %2545 = vst [vmem:[%s4165_s15 + $0x1b8] sm:$0xff] %v2364_v53  ;;  %v2175_v10 = vadd.f32 %v2174_v63, %v4448_v15  ;;  %v2368_v0 = vadd.f32 %v2367_v1, %v4451_v60 }
 0x2f4   : > { %2550 = vst [vmem:[%s4165_s15 + $0x1e0] sm:$0xff] %v2173_v43  ;;  %2552 = vst [vmem:[%s4165_s15 + $0x1f0] sm:$0xff] %v2366_v33 }
 0x2f5   : > { %2551 = vst [vmem:[%s4165_s15 + $0x1e8] sm:$0xff] %v2175_v10  ;;  %2553 = vst [vmem:[%s4165_s15 + $0x1f8] sm:$0xff] %v2368_v0 }
 0x2f7   : > { %v2178_v19 = vpop.f32.mrb[112].mxu1  ;;  %v2371_v21 = vpop.f32.mrb[112].mxu0 }
 0x2f8   : > { %v2179_v12 = vadd.f32 %v2178_v19, %v4440_v41  ;;  %v2372_v22 = vadd.f32 %v2371_v21, %v4443_v39  ;;  %v2180_v18 = vpop.f32.mrb[113].mxu1  ;;  %v2373_v2 = vpop.f32.mrb[113].mxu0 }
 0x2f9   : > { %v2181_v5 = vadd.f32 %v2180_v18, %v4448_v15  ;;  %v2374_v7 = vadd.f32 %v2373_v2, %v4451_v60  ;;  %v2182_v49 = vpop.f32.mrb[114].mxu1  ;;  %v2375_v47 = vpop.f32.mrb[114].mxu0 }
 0x2fa   : > { %2558 = vst [vmem:[%s4165_s15 + $0x220] sm:$0xff] %v2179_v12  ;;  %2560 = vst [vmem:[%s4165_s15 + $0x230] sm:$0xff] %v2372_v22  ;;  %v2183_v3 = vadd.f32 %v2182_v49, %v4440_v41  ;;  %v2376_v40 = vadd.f32 %v2375_v47, %v4443_v39  ;;  %v2184_v62 = vpop.f32.mrb[115].mxu1  ;;  %v2377_v25 = vpop.f32.mrb[115].mxu0 }
 0x2fb   : > { %2559 = vst [vmem:[%s4165_s15 + $0x228] sm:$0xff] %v2181_v5  ;;  %2561 = vst [vmem:[%s4165_s15 + $0x238] sm:$0xff] %v2374_v7  ;;  %v2185_v29 = vadd.f32 %v2184_v62, %v4448_v15  ;;  %v2378_v17 = vadd.f32 %v2377_v25, %v4451_v60 }
 0x2fc   : > { %2566 = vst [vmem:[%s4165_s15 + $0x260] sm:$0xff] %v2183_v3  ;;  %2568 = vst [vmem:[%s4165_s15 + $0x270] sm:$0xff] %v2376_v40 }
 0x2fd   : > { %2567 = vst [vmem:[%s4165_s15 + $0x268] sm:$0xff] %v2185_v29  ;;  %2569 = vst [vmem:[%s4165_s15 + $0x278] sm:$0xff] %v2378_v17 }
 0x2ff   : > { %v2188_v20 = vpop.f32.mrb[116].mxu1  ;;  %v2381_v61 = vpop.f32.mrb[116].mxu0 }
 0x300   : > { %v2189_v11 = vadd.f32 %v2188_v20, %v4440_v41  ;;  %v2382_v13 = vadd.f32 %v2381_v61, %v4443_v39  ;;  %v2190_v23 = vpop.f32.mrb[117].mxu1  ;;  %v2383_v14 = vpop.f32.mrb[117].mxu0 }
 0x301   : > { %v2191_v16 = vadd.f32 %v2190_v23, %v4448_v15  ;;  %v2384_v4 = vadd.f32 %v2383_v14, %v4451_v60  ;;  %v2192_v35 = vpop.f32.mrb[118].mxu1  ;;  %v2385_v55 = vpop.f32.mrb[118].mxu0 }
 0x302   : > { %2574 = vst [vmem:[%s4165_s15 + $0x2a0] sm:$0xff] %v2189_v11  ;;  %2576 = vst [vmem:[%s4165_s15 + $0x2b0] sm:$0xff] %v2382_v13  ;;  %v2193_v44 = vadd.f32 %v2192_v35, %v4440_v41  ;;  %v2386_v58 = vadd.f32 %v2385_v55, %v4443_v39  ;;  %v2194_v9 = vpop.f32.mrb[119].mxu1  ;;  %v2387_v34 = vpop.f32.mrb[119].mxu0 }
 0x303   : > { %2575 = vst [vmem:[%s4165_s15 + $0x2a8] sm:$0xff] %v2191_v16  ;;  %2577 = vst [vmem:[%s4165_s15 + $0x2b8] sm:$0xff] %v2384_v4  ;;  %v2195_v38 = vadd.f32 %v2194_v9, %v4448_v15  ;;  %v2388_v45 = vadd.f32 %v2387_v34, %v4451_v60 }
 0x304   : > { %2582 = vst [vmem:[%s4165_s15 + $0x2e0] sm:$0xff] %v2193_v44  ;;  %2584 = vst [vmem:[%s4165_s15 + $0x2f0] sm:$0xff] %v2386_v58 }
 0x305   : > { %2583 = vst [vmem:[%s4165_s15 + $0x2e8] sm:$0xff] %v2195_v38  ;;  %2585 = vst [vmem:[%s4165_s15 + $0x2f8] sm:$0xff] %v2388_v45 }
 0x307   : > { %v2198_v52 = vpop.f32.mrb[120].mxu1  ;;  %v2391_v56 = vpop.f32.mrb[120].mxu0 }
 0x308   : > { %v2199_v37 = vadd.f32 %v2198_v52, %v4440_v41  ;;  %v2392_v46 = vadd.f32 %v2391_v56, %v4443_v39  ;;  %v2200_v50 = vpop.f32.mrb[121].mxu1  ;;  %v2393_v42 = vpop.f32.mrb[121].mxu0 }
 0x309   : > { %v2201_v36 = vadd.f32 %v2200_v50, %v4448_v15  ;;  %v2394_v6 = vadd.f32 %v2393_v42, %v4451_v60  ;;  %v2202_v59 = vpop.f32.mrb[122].mxu1  ;;  %v2395_v8 = vpop.f32.mrb[122].mxu0 }
 0x30a   : > { %2590 = vst [vmem:[%s4165_s15 + $0x320] sm:$0xff] %v2199_v37  ;;  %2592 = vst [vmem:[%s4165_s15 + $0x330] sm:$0xff] %v2392_v46  ;;  %v2203_v24 = vadd.f32 %v2202_v59, %v4440_v41  ;;  %v2396_v26 = vadd.f32 %v2395_v8, %v4443_v39  ;;  %v2204_v48 = vpop.f32.mrb[123].mxu1  ;;  %v2397_v27 = vpop.f32.mrb[123].mxu0 }
 0x30b   : > { %2591 = vst [vmem:[%s4165_s15 + $0x328] sm:$0xff] %v2201_v36  ;;  %2593 = vst [vmem:[%s4165_s15 + $0x338] sm:$0xff] %v2394_v6  ;;  %v2205_v28 = vadd.f32 %v2204_v48, %v4448_v15  ;;  %v2398_v30 = vadd.f32 %v2397_v27, %v4451_v60 }
 0x30c   : > { %2598 = vst [vmem:[%s4165_s15 + $0x360] sm:$0xff] %v2203_v24  ;;  %2600 = vst [vmem:[%s4165_s15 + $0x370] sm:$0xff] %v2396_v26 }
 0x30d   : > { %2599 = vst [vmem:[%s4165_s15 + $0x368] sm:$0xff] %v2205_v28  ;;  %2601 = vst [vmem:[%s4165_s15 + $0x378] sm:$0xff] %v2398_v30 }
 0x30f   : > { %v2208_v31 = vpop.f32.mrb[124].mxu1  ;;  %v2401_v51 = vpop.f32.mrb[124].mxu0 }
 0x310   : > { %v2209_v32 = vadd.f32 %v2208_v31, %v4440_v41  ;;  %v2402_v53 = vadd.f32 %v2401_v51, %v4443_v39  ;;  %v2210_v54 = vpop.f32.mrb[125].mxu1  ;;  %v2403_v57 = vpop.f32.mrb[125].mxu0 }
 0x311   : > { %v2211_v43 = vadd.f32 %v2210_v54, %v4448_v15  ;;  %v2404_v33 = vadd.f32 %v2403_v57, %v4451_v60  ;;  %v2212_v63 = vpop.f32.mrb[126].mxu1  ;;  %v2405_v1 = vpop.f32.mrb[126].mxu0 }
 0x312   : > { %2606 = vst [vmem:[%s4165_s15 + $0x3a0] sm:$0xff] %v2209_v32  ;;  %2608 = vst [vmem:[%s4165_s15 + $0x3b0] sm:$0xff] %v2402_v53  ;;  %v2213_v10 = vadd.f32 %v2212_v63, %v4440_v41  ;;  %v2406_v0 = vadd.f32 %v2405_v1, %v4443_v39  ;;  %v2214_v19 = vpop.f32.mrb[127].mxu1  ;;  %v2407_v21 = vpop.f32.mrb[127].mxu0 }
 0x313   : > { %2607 = vst [vmem:[%s4165_s15 + $0x3a8] sm:$0xff] %v2211_v43  ;;  %2609 = vst [vmem:[%s4165_s15 + $0x3b8] sm:$0xff] %v2404_v33  ;;  %v2215_v12 = vadd.f32 %v2214_v19, %v4448_v15  ;;  %v2408_v22 = vadd.f32 %v2407_v21, %v4451_v60 }
 0x314   : > { %2614 = vst [vmem:[%s4165_s15 + $0x3e0] sm:$0xff] %v2213_v10  ;;  %2616 = vst [vmem:[%s4165_s15 + $0x3f0] sm:$0xff] %v2406_v0 }
 0x315   : > { %2615 = vst [vmem:[%s4165_s15 + $0x3e8] sm:$0xff] %v2215_v12  ;;  %2617 = vst [vmem:[%s4165_s15 + $0x3f8] sm:$0xff] %v2408_v22 }
 0x317   : > { %v2218_v18 = vpop.f32.mrb[128].mxu1  ;;  %v2411_v2 = vpop.f32.mrb[128].mxu0 }
 0x318   : > { %v2219_v5 = vadd.f32 %v2218_v18, %v4440_v41  ;;  %v2412_v7 = vadd.f32 %v2411_v2, %v4443_v39  ;;  %v2220_v49 = vpop.f32.mrb[129].mxu1  ;;  %v2413_v47 = vpop.f32.mrb[129].mxu0 }
 0x319   : > { %v2221_v3 = vadd.f32 %v2220_v49, %v4448_v15  ;;  %v2414_v40 = vadd.f32 %v2413_v47, %v4451_v60  ;;  %v2222_v62 = vpop.f32.mrb[130].mxu1  ;;  %v2415_v25 = vpop.f32.mrb[130].mxu0 }
 0x31a   : > { %2622 = vst [vmem:[%s4165_s15 + $0x420] sm:$0xff] %v2219_v5  ;;  %2624 = vst [vmem:[%s4165_s15 + $0x430] sm:$0xff] %v2412_v7  ;;  %v2223_v29 = vadd.f32 %v2222_v62, %v4440_v41  ;;  %v2416_v17 = vadd.f32 %v2415_v25, %v4443_v39  ;;  %v2224_v20 = vpop.f32.mrb[131].mxu1  ;;  %v2417_v61 = vpop.f32.mrb[131].mxu0 }
 0x31b   : > { %2623 = vst [vmem:[%s4165_s15 + $0x428] sm:$0xff] %v2221_v3  ;;  %2625 = vst [vmem:[%s4165_s15 + $0x438] sm:$0xff] %v2414_v40  ;;  %v2225_v11 = vadd.f32 %v2224_v20, %v4448_v15  ;;  %v2418_v13 = vadd.f32 %v2417_v61, %v4451_v60 }
 0x31c   : > { %2630 = vst [vmem:[%s4165_s15 + $0x460] sm:$0xff] %v2223_v29  ;;  %2632 = vst [vmem:[%s4165_s15 + $0x470] sm:$0xff] %v2416_v17 }
 0x31d   : > { %2631 = vst [vmem:[%s4165_s15 + $0x468] sm:$0xff] %v2225_v11  ;;  %2633 = vst [vmem:[%s4165_s15 + $0x478] sm:$0xff] %v2418_v13 }
 0x31f   : > { %v2228_v23 = vpop.f32.mrb[132].mxu1  ;;  %v2421_v14 = vpop.f32.mrb[132].mxu0 }
 0x320   : > { %v2229_v16 = vadd.f32 %v2228_v23, %v4440_v41  ;;  %v2422_v4 = vadd.f32 %v2421_v14, %v4443_v39  ;;  %v2230_v35 = vpop.f32.mrb[133].mxu1  ;;  %v2423_v55 = vpop.f32.mrb[133].mxu0 }
 0x321   : > { %v2231_v44 = vadd.f32 %v2230_v35, %v4448_v15  ;;  %v2424_v58 = vadd.f32 %v2423_v55, %v4451_v60  ;;  %v2232_v9 = vpop.f32.mrb[134].mxu1  ;;  %v2425_v34 = vpop.f32.mrb[134].mxu0 }
 0x322   : > { %2638 = vst [vmem:[%s4165_s15 + $0x4a0] sm:$0xff] %v2229_v16  ;;  %2640 = vst [vmem:[%s4165_s15 + $0x4b0] sm:$0xff] %v2422_v4  ;;  %v2233_v38 = vadd.f32 %v2232_v9, %v4440_v41  ;;  %v2426_v45 = vadd.f32 %v2425_v34, %v4443_v39  ;;  %v2234_v52 = vpop.f32.mrb[135].mxu1  ;;  %v2427_v56 = vpop.f32.mrb[135].mxu0 }
 0x323   : > { %2639 = vst [vmem:[%s4165_s15 + $0x4a8] sm:$0xff] %v2231_v44  ;;  %2641 = vst [vmem:[%s4165_s15 + $0x4b8] sm:$0xff] %v2424_v58  ;;  %v2235_v37 = vadd.f32 %v2234_v52, %v4448_v15  ;;  %v2428_v46 = vadd.f32 %v2427_v56, %v4451_v60 }
 0x324   : > { %2646 = vst [vmem:[%s4165_s15 + $0x4e0] sm:$0xff] %v2233_v38  ;;  %2648 = vst [vmem:[%s4165_s15 + $0x4f0] sm:$0xff] %v2426_v45 }
 0x325   : > { %2647 = vst [vmem:[%s4165_s15 + $0x4e8] sm:$0xff] %v2235_v37  ;;  %2649 = vst [vmem:[%s4165_s15 + $0x4f8] sm:$0xff] %v2428_v46 }
 0x327   : > { %v2238_v50 = vpop.f32.mrb[136].mxu1  ;;  %v2431_v42 = vpop.f32.mrb[136].mxu0 }
 0x328   : > { %v2239_v36 = vadd.f32 %v2238_v50, %v4440_v41  ;;  %v2432_v6 = vadd.f32 %v2431_v42, %v4443_v39  ;;  %v2240_v59 = vpop.f32.mrb[137].mxu1  ;;  %v2433_v8 = vpop.f32.mrb[137].mxu0 }
 0x329   : > { %v2241_v24 = vadd.f32 %v2240_v59, %v4448_v15  ;;  %v2434_v26 = vadd.f32 %v2433_v8, %v4451_v60  ;;  %v2242_v48 = vpop.f32.mrb[138].mxu1  ;;  %v2435_v27 = vpop.f32.mrb[138].mxu0 }
 0x32a   : > { %2654 = vst [vmem:[%s4165_s15 + $0x520] sm:$0xff] %v2239_v36  ;;  %2656 = vst [vmem:[%s4165_s15 + $0x530] sm:$0xff] %v2432_v6  ;;  %v2243_v28 = vadd.f32 %v2242_v48, %v4440_v41  ;;  %v2436_v30 = vadd.f32 %v2435_v27, %v4443_v39  ;;  %v2244_v31 = vpop.f32.mrb[139].mxu1  ;;  %v2437_v51 = vpop.f32.mrb[139].mxu0 }
 0x32b   : > { %2655 = vst [vmem:[%s4165_s15 + $0x528] sm:$0xff] %v2241_v24  ;;  %2657 = vst [vmem:[%s4165_s15 + $0x538] sm:$0xff] %v2434_v26  ;;  %v2245_v32 = vadd.f32 %v2244_v31, %v4448_v15  ;;  %v2438_v53 = vadd.f32 %v2437_v51, %v4451_v60 }
 0x32c   : > { %2662 = vst [vmem:[%s4165_s15 + $0x560] sm:$0xff] %v2243_v28  ;;  %2664 = vst [vmem:[%s4165_s15 + $0x570] sm:$0xff] %v2436_v30 }
 0x32d   : > { %2663 = vst [vmem:[%s4165_s15 + $0x568] sm:$0xff] %v2245_v32  ;;  %2665 = vst [vmem:[%s4165_s15 + $0x578] sm:$0xff] %v2438_v53 }
 0x32f   : > { %v2248_v54 = vpop.f32.mrb[140].mxu1  ;;  %v2441_v57 = vpop.f32.mrb[140].mxu0 }
 0x330   : > { %v2249_v43 = vadd.f32 %v2248_v54, %v4440_v41  ;;  %v2442_v33 = vadd.f32 %v2441_v57, %v4443_v39  ;;  %v2250_v63 = vpop.f32.mrb[141].mxu1  ;;  %v2443_v1 = vpop.f32.mrb[141].mxu0 }
 0x331   : > { %v2251_v10 = vadd.f32 %v2250_v63, %v4448_v15  ;;  %v2444_v0 = vadd.f32 %v2443_v1, %v4451_v60  ;;  %v2252_v19 = vpop.f32.mrb[142].mxu1  ;;  %v2445_v21 = vpop.f32.mrb[142].mxu0 }
 0x332   : > { %2670 = vst [vmem:[%s4165_s15 + $0x5a0] sm:$0xff] %v2249_v43  ;;  %2672 = vst [vmem:[%s4165_s15 + $0x5b0] sm:$0xff] %v2442_v33  ;;  %v2253_v12 = vadd.f32 %v2252_v19, %v4440_v41  ;;  %v2446_v22 = vadd.f32 %v2445_v21, %v4443_v39  ;;  %v2254_v18 = vpop.f32.mrb[143].mxu1  ;;  %v2447_v2 = vpop.f32.mrb[143].mxu0 }
 0x333   : > { %2671 = vst [vmem:[%s4165_s15 + $0x5a8] sm:$0xff] %v2251_v10  ;;  %2673 = vst [vmem:[%s4165_s15 + $0x5b8] sm:$0xff] %v2444_v0  ;;  %v2255_v5 = vadd.f32 %v2254_v18, %v4448_v15  ;;  %v2448_v7 = vadd.f32 %v2447_v2, %v4451_v60 }
 0x334   : > { %2678 = vst [vmem:[%s4165_s15 + $0x5e0] sm:$0xff] %v2253_v12  ;;  %2680 = vst [vmem:[%s4165_s15 + $0x5f0] sm:$0xff] %v2446_v22 }
 0x335   : > { %2679 = vst [vmem:[%s4165_s15 + $0x5e8] sm:$0xff] %v2255_v5  ;;  %2681 = vst [vmem:[%s4165_s15 + $0x5f8] sm:$0xff] %v2448_v7 }
 0x337   : > { %v2258_v49 = vpop.f32.mrb[144].mxu1  ;;  %v2451_v47 = vpop.f32.mrb[144].mxu0 }
 0x338   : > { %v2259_v3 = vadd.f32 %v2258_v49, %v4440_v41  ;;  %v2452_v40 = vadd.f32 %v2451_v47, %v4443_v39  ;;  %v2260_v62 = vpop.f32.mrb[145].mxu1  ;;  %v2453_v25 = vpop.f32.mrb[145].mxu0 }
 0x339   : > { %v2261_v29 = vadd.f32 %v2260_v62, %v4448_v15  ;;  %v2454_v17 = vadd.f32 %v2453_v25, %v4451_v60  ;;  %v2262_v20 = vpop.f32.mrb[146].mxu1  ;;  %v2455_v61 = vpop.f32.mrb[146].mxu0 }
 0x33a   : > { %2686 = vst [vmem:[%s4165_s15 + $0x620] sm:$0xff] %v2259_v3  ;;  %2688 = vst [vmem:[%s4165_s15 + $0x630] sm:$0xff] %v2452_v40  ;;  %v2263_v11 = vadd.f32 %v2262_v20, %v4440_v41  ;;  %v2456_v13 = vadd.f32 %v2455_v61, %v4443_v39  ;;  %v2264_v23 = vpop.f32.mrb[147].mxu1  ;;  %v2457_v14 = vpop.f32.mrb[147].mxu0 }
 0x33b   : > { %2687 = vst [vmem:[%s4165_s15 + $0x628] sm:$0xff] %v2261_v29  ;;  %2689 = vst [vmem:[%s4165_s15 + $0x638] sm:$0xff] %v2454_v17  ;;  %v2265_v16 = vadd.f32 %v2264_v23, %v4448_v15  ;;  %v2458_v4 = vadd.f32 %v2457_v14, %v4451_v60 }
 0x33c   : > { %2694 = vst [vmem:[%s4165_s15 + $0x660] sm:$0xff] %v2263_v11  ;;  %2696 = vst [vmem:[%s4165_s15 + $0x670] sm:$0xff] %v2456_v13 }
 0x33d   : > { %2695 = vst [vmem:[%s4165_s15 + $0x668] sm:$0xff] %v2265_v16  ;;  %2697 = vst [vmem:[%s4165_s15 + $0x678] sm:$0xff] %v2458_v4 }
 0x33f   : > { %v2268_v35 = vpop.f32.mrb[148].mxu1  ;;  %v2461_v55 = vpop.f32.mrb[148].mxu0 }
 0x340   : > { %v2269_v44 = vadd.f32 %v2268_v35, %v4440_v41  ;;  %v2462_v58 = vadd.f32 %v2461_v55, %v4443_v39  ;;  %v2270_v9 = vpop.f32.mrb[149].mxu1  ;;  %v2463_v34 = vpop.f32.mrb[149].mxu0 }
 0x341   : > { %v2271_v38 = vadd.f32 %v2270_v9, %v4448_v15  ;;  %v2464_v45 = vadd.f32 %v2463_v34, %v4451_v60  ;;  %v2272_v52 = vpop.f32.mrb[150].mxu1  ;;  %v2465_v56 = vpop.f32.mrb[150].mxu0 }
 0x342   : > { %2702 = vst [vmem:[%s4165_s15 + $0x6a0] sm:$0xff] %v2269_v44  ;;  %2704 = vst [vmem:[%s4165_s15 + $0x6b0] sm:$0xff] %v2462_v58  ;;  %v2273_v37 = vadd.f32 %v2272_v52, %v4440_v41  ;;  %v2466_v46 = vadd.f32 %v2465_v56, %v4443_v39  ;;  %v2274_v50 = vpop.f32.mrb[151].mxu1  ;;  %v2467_v42 = vpop.f32.mrb[151].mxu0 }
 0x343   : > { %2703 = vst [vmem:[%s4165_s15 + $0x6a8] sm:$0xff] %v2271_v38  ;;  %2705 = vst [vmem:[%s4165_s15 + $0x6b8] sm:$0xff] %v2464_v45  ;;  %v2275_v36 = vadd.f32 %v2274_v50, %v4448_v15  ;;  %v2468_v6 = vadd.f32 %v2467_v42, %v4451_v60 }
 0x344   : > { %2710 = vst [vmem:[%s4165_s15 + $0x6e0] sm:$0xff] %v2273_v37  ;;  %2712 = vst [vmem:[%s4165_s15 + $0x6f0] sm:$0xff] %v2466_v46 }
 0x345   : > { %2711 = vst [vmem:[%s4165_s15 + $0x6e8] sm:$0xff] %v2275_v36  ;;  %2713 = vst [vmem:[%s4165_s15 + $0x6f8] sm:$0xff] %v2468_v6 }
 0x347   : > { %v2278_v59 = vpop.f32.mrb[152].mxu1  ;;  %v2471_v8 = vpop.f32.mrb[152].mxu0 }
 0x348   : > { %v2279_v24 = vadd.f32 %v2278_v59, %v4440_v41  ;;  %v2472_v26 = vadd.f32 %v2471_v8, %v4443_v39  ;;  %v2280_v48 = vpop.f32.mrb[153].mxu1  ;;  %v2473_v27 = vpop.f32.mrb[153].mxu0 }
 0x349   : > { %v2281_v28 = vadd.f32 %v2280_v48, %v4448_v15  ;;  %v2474_v30 = vadd.f32 %v2473_v27, %v4451_v60  ;;  %v2282_v31 = vpop.f32.mrb[154].mxu1  ;;  %v2475_v51 = vpop.f32.mrb[154].mxu0 }
 0x34a   : > { %2718 = vst [vmem:[%s4165_s15 + $0x720] sm:$0xff] %v2279_v24  ;;  %2720 = vst [vmem:[%s4165_s15 + $0x730] sm:$0xff] %v2472_v26  ;;  %v2283_v32 = vadd.f32 %v2282_v31, %v4440_v41  ;;  %v2476_v53 = vadd.f32 %v2475_v51, %v4443_v39  ;;  %v2284_v54 = vpop.f32.mrb[155].mxu1  ;;  %v2477_v57 = vpop.f32.mrb[155].mxu0 }
 0x34b   : > { %2719 = vst [vmem:[%s4165_s15 + $0x728] sm:$0xff] %v2281_v28  ;;  %2721 = vst [vmem:[%s4165_s15 + $0x738] sm:$0xff] %v2474_v30  ;;  %v2285_v43 = vadd.f32 %v2284_v54, %v4448_v15  ;;  %v2478_v33 = vadd.f32 %v2477_v57, %v4451_v60 }
 0x34c   : > { %2726 = vst [vmem:[%s4165_s15 + $0x760] sm:$0xff] %v2283_v32  ;;  %2728 = vst [vmem:[%s4165_s15 + $0x770] sm:$0xff] %v2476_v53 }
 0x34d   : > { %2727 = vst [vmem:[%s4165_s15 + $0x768] sm:$0xff] %v2285_v43  ;;  %2729 = vst [vmem:[%s4165_s15 + $0x778] sm:$0xff] %v2478_v33 }
 0x34f   : > { %v2288_v63 = vpop.f32.mrb[156].mxu1  ;;  %v2481_v1 = vpop.f32.mrb[156].mxu0 }
 0x350   : > { %v2289_v10 = vadd.f32 %v2288_v63, %v4440_v41  ;;  %v2482_v0 = vadd.f32 %v2481_v1, %v4443_v39  ;;  %v2290_v19 = vpop.f32.mrb[157].mxu1  ;;  %v2483_v21 = vpop.f32.mrb[157].mxu0 }
 0x351   : > { %v2291_v12 = vadd.f32 %v2290_v19, %v4448_v15  ;;  %v2484_v22 = vadd.f32 %v2483_v21, %v4451_v60  ;;  %v2292_v18 = vpop.f32.mrb[158].mxu1  ;;  %v2485_v2 = vpop.f32.mrb[158].mxu0 }
 0x352   : > { %2734 = vst [vmem:[%s4165_s15 + $0x7a0] sm:$0xff] %v2289_v10  ;;  %2736 = vst [vmem:[%s4165_s15 + $0x7b0] sm:$0xff] %v2482_v0  ;;  %v2293_v5 = vadd.f32 %v2292_v18, %v4440_v41  ;;  %v2486_v7 = vadd.f32 %v2485_v2, %v4443_v39  ;;  %v2294_v49 = vpop.f32.mrb[159].mxu1  ;;  %v2487_v47 = vpop.f32.mrb[159].mxu0 }
 0x353   : > { %2735 = vst [vmem:[%s4165_s15 + $0x7a8] sm:$0xff] %v2291_v12  ;;  %2737 = vst [vmem:[%s4165_s15 + $0x7b8] sm:$0xff] %v2484_v22  ;;  %v2295_v3 = vadd.f32 %v2294_v49, %v4448_v15  ;;  %v2488_v41 = vadd.f32 %v2487_v47, %v4451_v60 }
 0x354   : > { %2742 = vst [vmem:[%s4165_s15 + $0x7e0] sm:$0xff] %v2293_v5  ;;  %2744 = vst [vmem:[%s4165_s15 + $0x7f0] sm:$0xff] %v2486_v7 }
 0x355   : > { %2743 = vst [vmem:[%s4165_s15 + $0x7e8] sm:$0xff] %v2295_v3  ;;  %2745 = vst [vmem:[%s4165_s15 + $0x7f8] sm:$0xff] %v2488_v41 }
 0x356   : > { %3349 = shalt.err (!%p3346_p6)
}
 0x357   : > { %s3350_s12 = scalar_lea.hbm %s4706_s29, 32768  ;;  %s3354_s11 = scalar_lea.hbm %s4771_s5, 65536 }
 0x358   : > { %p3351_p7 = scmp.ne.s32.totalorder %s4706_s29, %s3350_s12  ;;  %p3355_p0 = scmp.lt.u32.totalorder %s4706_s29, %s4771_s5 }
 0x359   : > { %p3356_p2 = scmp.lt.u32.totalorder %s3354_s11, %s3350_s12  ;;  %p3358_p1 = scmp.lt.u32.totalorder %s3350_s12, %s4706_s29 }
 0x35a   : > { %p3352_p9 = pnand %p3351_p7, %p4790_p4 }
 0x35b   : > { %p3357_p13 = por %p3356_p2, %p3355_p0 }
 0x35c   : > { %p3353_p12 = pneg %p3352_p9 }
 0x35d   : > { %p3359_p8 = por %p3358_p1, %p3357_p13 }
 0x35f   : > { %p3360_p10 = pnand %p3359_p8, %p3353_p12 }
 0x361   : > { %3363 = shalt.err (!%p3360_p10)
}
 0x362   : > { %s3438_s26 = smov 1024   ;;  %s3439_s14 = smov 64  }
 0x363   : > { %3097 = dma.vmem_to_hbm [thread:$0]  (%p4790_p4), %s4708_s17, 32768, %s4706_s29, %s4720_s9, %s3438_s26, %s3438_s26, %s3439_s14  }
 0x364 PF: > { %p3124_p11 = scmp.ge.s32.totalorder %s3426_s23, 2  ;;  %s2778_s15 = sand.u32 1, %s3406_s18  }
 0x365   : > { %p4791_p3 = scmp.ne.s32.totalorder %s4782_s30, 0  ;;  %s2779_s16 = scalar_lea.sflag [#allocation5], %s2778_s15 }
 0x367   : > { %p3113_p5 = pnand %p3124_p11, %p4791_p3 }
 0x369   : > { %3401 = dma.done.wait (!%p3113_p5), %s2779_s16, 32768  }
 0x36a   : > { %3403 = vsyncadd (!%p3113_p5), %s2779_s16, 4294934528  ;;  %s21_s23 = sadd.s32 1, %s3426_s23   ;;  %s4792_s21 = sld [smem:[#allocation16_spill]] }
 0x36b   : > { %p18_p6 = scmp.ge.s32.totalorder %s21_s23, 4   ;;  %s4793_s22 = sld [smem:[#allocation17_spill]] }
 0x36c   : > { %s4794_s18 = smov %s3410_s19  ;;  %s4795_s19 = smov %s3414_s20 }
 0x36d   : > { %s4796_s20 = smov %s3523_s6  ;;  %20 = sbr.rel (!%p18_p6) target bundleno = 9 (0x9), region = 98 }
 0x374   :  { %2784 = vsyncpa [#allocation4], 1 }
 0x375   :  { %2786 = vsyncpa [#allocation4 + $0x1], 1 }
 0x376   :  { %2787 = vsyncpa [#allocation7], 1 }
 0x377   :  { %2788 = vsyncpa [#allocation10], 1 }
 0x378   :  { %2789 = vsyncpa [#allocation5], 1 }
 0x379   :  { %2791 = vsyncpa [#allocation5 + $0x1], 1 }

</bundles_post_ra>
